<compile_context>
chip_gen: v7x
topology: tpu7x:2x2x1
jax: 0.10.0
libtpu: 0.0.40
codegen_flags: <defaults>
</compile_context>

<pallas_src>
import functools
import math

import jax
import jax.numpy as jnp
from jax.experimental import pallas as pl
from jax.experimental.pallas import tpu as pltpu

_LN_EPS = 1e-5
_NEG_INF = -1e30


# ----------------------------------------------------------------------------
# hardware / tiling helpers
# ----------------------------------------------------------------------------
@functools.lru_cache(maxsize=None)
def _vmem_limit():
    """Generation-aware VMEM budget (v5e/v6e: 128 MiB physical, v7x: 64 MiB)."""
    try:
        cap = pltpu.get_tpu_info().vmem_capacity_bytes
    except Exception:
        return 48 * 1024 * 1024
    if cap >= 100 * 1024 * 1024:
        return 96 * 1024 * 1024          # v5e / v6e: use the big VMEM
    return 36 * 1024 * 1024              # v7x: leave headroom of 64 MiB physical


def _round_up(n, m):
    return ((n + m - 1) // m) * m


def _tile(total, target, align):
    """Return (tile, padded_total). tile is aligned (or the full padded dim)."""
    padded = _round_up(total, align)
    if padded <= target:
        return padded, padded
    return target, _round_up(total, target)


def _tile_rows(total, target):
    """Row tiling that guarantees >=2 blocks when possible (v7x has 2 TCs)."""
    tile, padded = _tile(total, target, 8)
    if padded // tile < 2 and tile % 16 == 0:
        tile //= 2
    return tile, padded


def _pad_dim(x, axis, new_size):
    if x.shape[axis] == new_size:
        return x
    widths = [(0, 0)] * x.ndim
    widths[axis] = (0, new_size - x.shape[axis])
    return jnp.pad(x, widths)


def _head_block(num_heads, dh):
    """# heads processed per attention grid step (divisor of num_heads)."""
    hb = max(1, min(num_heads, 128 // max(dh, 1)))
    while num_heads % hb:
        hb -= 1
    return hb


# ----------------------------------------------------------------------------
# Pallas kernels
# ----------------------------------------------------------------------------
def _linear_kernel(x_ref, w_ref, b_ref, o_ref):
    acc = jnp.dot(x_ref[...], w_ref[...], preferred_element_type=jnp.float32)
    o_ref[...] = (acc + b_ref[...]).astype(o_ref.dtype)


def linear(x, w, b, out_dtype=jnp.bfloat16):
    """x: (N, Din) @ w: (Din, Dout) + b -> (N, Dout); row+col tiled."""
    N, Din = x.shape
    Dout = w.shape[1]
    tm, Np = _tile_rows(N, 512)
    tn, Dp = _tile(Dout, 1024, 128)

    xp = _pad_dim(x.astype(jnp.bfloat16), 0, Np)
    wp = _pad_dim(w.astype(jnp.bfloat16), 1, Dp)
    bp = _pad_dim(b.astype(jnp.float32).reshape(1, Dout), 1, Dp)

    out = pl.pallas_call(
        _linear_kernel,
        out_shape=jax.ShapeDtypeStruct((Np, Dp), out_dtype),
        grid=(Np // tm, Dp // tn),
        in_specs=[
            pl.BlockSpec((tm, Din), lambda i, j: (i, 0)),
            pl.BlockSpec((Din, tn), lambda i, j: (0, j)),
            pl.BlockSpec((1, tn), lambda i, j: (0, j)),
        ],
        out_specs=pl.BlockSpec((tm, tn), lambda i, j: (i, j)),
        compiler_params=pltpu.CompilerParams(
            dimension_semantics=("parallel", "parallel"),
            vmem_limit_bytes=_vmem_limit()),
    )(xp, wp, bp)
    if (Np, Dp) != (N, Dout):
        out = out[:N, :Dout]
    return out


def _linear_ln_kernel(x_ref, w_ref, b_ref, res_ref, g_ref, be_ref, o_ref, *, eps):
    y = jnp.dot(x_ref[...], w_ref[...], preferred_element_type=jnp.float32)
    y = y + b_ref[...] + res_ref[...].astype(jnp.float32)
    mu = jnp.mean(y, axis=-1, keepdims=True)
    var = jnp.mean(jnp.square(y - mu), axis=-1, keepdims=True)
    yn = (y - mu) * jax.lax.rsqrt(var + eps)
    o_ref[...] = (yn * g_ref[...] + be_ref[...]).astype(o_ref.dtype)


def linear_ln(x, w, b, res, gamma, beta, out_dtype=jnp.bfloat16):
    """LayerNorm(x @ w + b + res); row-tiled, weights resident, LN fused."""
    N, Din = x.shape
    D = w.shape[1]
    tm, Np = _tile_rows(N, 512)

    xp = _pad_dim(x.astype(jnp.bfloat16), 0, Np)
    rp = _pad_dim(res, 0, Np)
    kern = functools.partial(_linear_ln_kernel, eps=_LN_EPS)
    out = pl.pallas_call(
        kern,
        out_shape=jax.ShapeDtypeStruct((Np, D), out_dtype),
        grid=(Np // tm,),
        in_specs=[
            pl.BlockSpec((tm, Din), lambda i: (i, 0)),
            pl.BlockSpec((Din, D), lambda i: (0, 0)),
            pl.BlockSpec((1, D), lambda i: (0, 0)),
            pl.BlockSpec((tm, D), lambda i: (i, 0)),
            pl.BlockSpec((1, D), lambda i: (0, 0)),
            pl.BlockSpec((1, D), lambda i: (0, 0)),
        ],
        out_specs=pl.BlockSpec((tm, D), lambda i: (i, 0)),
        compiler_params=pltpu.CompilerParams(
            dimension_semantics=("parallel",),
            vmem_limit_bytes=_vmem_limit()),
    )(xp, w.astype(jnp.bfloat16), b.astype(jnp.float32).reshape(1, D), rp,
      gamma.astype(jnp.float32).reshape(1, D),
      beta.astype(jnp.float32).reshape(1, D))
    return out[:N] if Np != N else out


def _ffn_ln_kernel(x_ref, w1_ref, b1_ref, w2_ref, b2_ref, g_ref, be_ref, o_ref,
                   *, eps):
    x = x_ref[...]
    h = jnp.dot(x, w1_ref[...], preferred_element_type=jnp.float32) + b1_ref[...]
    h = jnp.maximum(h, 0.0).astype(jnp.bfloat16)
    y = jnp.dot(h, w2_ref[...], preferred_element_type=jnp.float32) + b2_ref[...]
    y = y + x.astype(jnp.float32)                      # residual
    mu = jnp.mean(y, axis=-1, keepdims=True)
    var = jnp.mean(jnp.square(y - mu), axis=-1, keepdims=True)
    yn = (y - mu) * jax.lax.rsqrt(var + eps)
    o_ref[...] = (yn * g_ref[...] + be_ref[...]).astype(o_ref.dtype)


def ffn_ln(x, w1, b1, w2, b2, gamma, beta, out_dtype=jnp.bfloat16):
    """LayerNorm(x + relu(x@w1+b1)@w2+b2), fused, row-tiled."""
    # TODO(synk): for very large FFN hidden dims on v7x (64 MiB VMEM) the hidden
    # dim should get its own 'arbitrary' grid axis; at these sizes it fits.
    N, D = x.shape
    Dh = w1.shape[1]
    tm, Np = _tile_rows(N, 512)

    xp = _pad_dim(x.astype(jnp.bfloat16), 0, Np)
    kern = functools.partial(_ffn_ln_kernel, eps=_LN_EPS)
    out = pl.pallas_call(
        kern,
        out_shape=jax.ShapeDtypeStruct((Np, D), out_dtype),
        grid=(Np // tm,),
        in_specs=[
            pl.BlockSpec((tm, D), lambda i: (i, 0)),
            pl.BlockSpec((D, Dh), lambda i: (0, 0)),
            pl.BlockSpec((1, Dh), lambda i: (0, 0)),
            pl.BlockSpec((Dh, D), lambda i: (0, 0)),
            pl.BlockSpec((1, D), lambda i: (0, 0)),
            pl.BlockSpec((1, D), lambda i: (0, 0)),
            pl.BlockSpec((1, D), lambda i: (0, 0)),
        ],
        out_specs=pl.BlockSpec((tm, D), lambda i: (i, 0)),
        compiler_params=pltpu.CompilerParams(
            dimension_semantics=("parallel",),
            vmem_limit_bytes=_vmem_limit()),
    )(xp, w1.astype(jnp.bfloat16), b1.astype(jnp.float32).reshape(1, Dh),
      w2.astype(jnp.bfloat16), b2.astype(jnp.float32).reshape(1, D),
      gamma.astype(jnp.float32).reshape(1, D),
      beta.astype(jnp.float32).reshape(1, D))
    return out[:N] if Np != N else out


def _flash_attn_kernel(valid_ref, q_ref, k_ref, v_ref, o_ref,
                       m_sc, l_sc, acc_sc, *, causal, tq, tk):
    g = pl.program_id(0)      # head-group index
    qi = pl.program_id(1)
    ki = pl.program_id(2)
    nk = pl.num_programs(2)

    @pl.when(ki == 0)
    def _():
        m_sc[...] = jnp.full_like(m_sc, _NEG_INF)
        l_sc[...] = jnp.zeros_like(l_sc)
        acc_sc[...] = jnp.zeros_like(acc_sc)

    valid = valid_ref[g]
    k_start = ki * tk
    live = k_start < valid                                  # past valid_length?
    if causal:
        live = jnp.logical_and(live, k_start <= qi * tq + (tq - 1))  # above diag?

    @pl.when(live)  # fully-masked KV blocks skip all MXU/VPU/EUP work
    def _():
        q = q_ref[...]                      # (hblk, tq, Dh) bf16, scale pre-folded
        k = k_ref[...]                      # (hblk, tk, Dh)
        v = v_ref[...]                      # (hblk, tk, Dh)

        s = jnp.einsum("hqd,hkd->hqk", q, k,
                       preferred_element_type=jnp.float32)  # (hblk, tq, tk)

        col = k_start + jax.lax.broadcasted_iota(jnp.int32, (1, tq, tk), 2)
        mask = col < valid
        if causal:
            row = qi * tq + jax.lax.broadcasted_iota(jnp.int32, (1, tq, tk), 1)
            mask = jnp.logical_and(mask, col <= row)
        s = jnp.where(mask, s, _NEG_INF)

        # online softmax update
        m_prev = m_sc[...]
        m_new = jnp.maximum(m_prev, jnp.max(s, axis=-1, keepdims=True))
        alpha = jnp.exp(m_prev - m_new)
        p = jnp.exp(s - m_new)
        l_sc[...] = alpha * l_sc[...] + jnp.sum(p, axis=-1, keepdims=True)
        acc_sc[...] = alpha * acc_sc[...] + jnp.einsum(
            "hqk,hkd->hqd", p.astype(jnp.bfloat16), v,
            preferred_element_type=jnp.float32)
        m_sc[...] = m_new

    @pl.when(ki == nk - 1)
    def _():
        l = l_sc[...]
        denom = jnp.where(l > 0.0, l, 1.0)   # guard valid_length == 0 rows
        o_ref[...] = (acc_sc[...] *
                      pl.reciprocal(denom, approx=True)).astype(o_ref.dtype)


def attention(q, k, v, valid_b, causal, num_heads):
    """q: (B*H, Sq, Dh), k/v: (B*H, Sk, Dh), valid_b: (B,) int32 key lengths."""
    BH, Sq, Dh = q.shape
    Sk = k.shape[1]
    hblk = _head_block(num_heads, Dh)
    groups = BH // hblk
    tq, Sqp = _tile(Sq, 256, 8)
    tk, Skp = _tile(Sk, 1024, 8)

    qp = _pad_dim(q.astype(jnp.bfloat16), 1, Sqp)
    kp = _pad_dim(k.astype(jnp.bfloat16), 1, Skp)
    vp = _pad_dim(v.astype(jnp.bfloat16), 1, Skp)
    # one valid length per head-group (head groups never cross a batch boundary)
    valid_g = jnp.repeat(valid_b.astype(jnp.int32), num_heads // hblk)

    kern = functools.partial(_flash_attn_kernel, causal=causal, tq=tq, tk=tk)
    out = pl.pallas_call(
        kern,
        out_shape=jax.ShapeDtypeStruct((BH, Sqp, Dh), jnp.bfloat16),
        grid_spec=pltpu.PrefetchScalarGridSpec(
            num_scalar_prefetch=1,
            grid=(groups, Sqp // tq, Skp // tk),
            in_specs=[
                pl.BlockSpec((hblk, tq, Dh), lambda g, i, j, vl: (g, i, 0)),
                pl.BlockSpec((hblk, tk, Dh), lambda g, i, j, vl: (g, j, 0)),
                pl.BlockSpec((hblk, tk, Dh), lambda g, i, j, vl: (g, j, 0)),
            ],
            out_specs=pl.BlockSpec((hblk, tq, Dh), lambda g, i, j, vl: (g, i, 0)),
            scratch_shapes=[
                pltpu.VMEM((hblk, tq, 1), jnp.float32),    # running max
                pltpu.VMEM((hblk, tq, 1), jnp.float32),    # running denom
                pltpu.VMEM((hblk, tq, Dh), jnp.float32),   # accumulator
            ],
        ),
        compiler_params=pltpu.CompilerParams(
            dimension_semantics=("parallel", "parallel", "arbitrary"),
            vmem_limit_bytes=_vmem_limit()),
    )(valid_g, qp, kp, vp)
    return out[:, :Sq] if Sqp != Sq else out


# ----------------------------------------------------------------------------
# JAX glue: positional encoding, multi-head attention, blocks
# ----------------------------------------------------------------------------
def positional_encoding(seq_len, d_model, base):
    # TODO(synk): assumes even d_model (same as the original reference code).
    pos = jnp.arange(seq_len, dtype=jnp.float32)[:, None]
    i = jnp.arange(0, d_model, 2, dtype=jnp.float32)[None, :]
    angle = pos / jnp.power(float(base), i / float(d_model))
    pe = jnp.zeros((seq_len, d_model), dtype=jnp.float32)
    pe = pe.at[:, 0::2].set(jnp.sin(angle))
    pe = pe.at[:, 1::2].set(jnp.cos(angle))
    return pe  # (seq_len, d_model)


def multi_head_attention(q_in, k_in, v_in, valid_b, p, num_heads, causal,
                         residual, ln_g, ln_b):
    B, Sq, D = q_in.shape
    Sk = k_in.shape[1]
    Dh = D // num_heads

    if "wqkv" in p:
        # self-attention: fused QKV projection, one (N, D) x (D, 3D) matmul
        qkv = linear(q_in.reshape(B * Sq, D), p["wqkv"], p["bqkv"])
        q = qkv[:, :D].reshape(B, Sq, D)
        k = qkv[:, D:2 * D].reshape(B, Sk, D)
        v = qkv[:, 2 * D:].reshape(B, Sk, D)
    else:
        # cross attention: q alone, K|V fused
        q = linear(q_in.reshape(B * Sq, D), p["wq"], p["bq"]).reshape(B, Sq, D)
        kv = linear(k_in.reshape(B * Sk, D), p["wkv"], p["bkv"])
        k = kv[:, :D].reshape(B, Sk, D)
        v = kv[:, D:].reshape(B, Sk, D)

    # TODO(synk): the head split/merge stays as XLA transposes; writing the
    # projections directly in (B*H, S, Dh) layout would need in-kernel lane
    # reshapes that Mosaic handles poorly when Dh < 128.
    def split(x, S):
        return (x.reshape(B, S, num_heads, Dh)
                 .transpose(0, 2, 1, 3)
                 .reshape(B * num_heads, S, Dh))

    oh = attention(split(q, Sq), split(k, Sk), split(v, Sk),
                   valid_b, causal, num_heads)                   # (BH, Sq, Dh)
    o = (oh.reshape(B, num_heads, Sq, Dh)
           .transpose(0, 2, 1, 3)
           .reshape(B * Sq, D))

    # output projection fused with residual add + LayerNorm
    out = linear_ln(o, p["wo"], p["bo"], residual.reshape(B * Sq, D), ln_g, ln_b)
    return out.reshape(B, Sq, D)


def encoder_forward(p, enc_X, valid_length, pe_base, num_heads):
    B, S, D = enc_X.shape
    x = (enc_X * math.sqrt(D) +
         positional_encoding(S, D, pe_base)[None]).astype(jnp.bfloat16)
    y = multi_head_attention(x, x, x, valid_length, p["attn"], num_heads,
                             causal=False, residual=x,
                             ln_g=p["ln1_g"], ln_b=p["ln1_b"])
    out = ffn_ln(y.reshape(B * S, D), p["ffn_w1"], p["ffn_b1"],
                 p["ffn_w2"], p["ffn_b2"], p["ln2_g"], p["ln2_b"])
    return out.reshape(B, S, D)


def decoder_init_state(enc_output, valid_length):
    return (enc_output, valid_length)


def decoder_forward(p, dec_X, state, num_heads, dec_valid, pe_base):
    enc_output, enc_valid = state
    B, S, D = dec_X.shape

    x = (dec_X * math.sqrt(D) +
         positional_encoding(S, D, pe_base)[None]).astype(jnp.bfloat16)
    # masked (causal) self-attention + residual + LN (fused epilogue)
    y1 = multi_head_attention(x, x, x, dec_valid, p["self_attn"], num_heads,
                              causal=True, residual=x,
                              ln_g=p["ln1_g"], ln_b=p["ln1_b"])
    # encoder-decoder attention, masked by encoder valid_length
    y2 = multi_head_attention(y1, enc_output, enc_output, enc_valid,
                              p["cross_attn"], num_heads, causal=False,
                              residual=y1, ln_g=p["ln2_g"], ln_b=p["ln2_b"])
    # position-wise FFN + residual + LN (fused)
    y3 = ffn_ln(y2.reshape(B * S, D), p["ffn_w1"], p["ffn_b1"],
                p["ffn_w2"], p["ffn_b2"], p["ln3_g"], p["ln3_b"])
    # final dense projection to vocab (lane-dense, row/col tiled)
    V = p["out_w"].shape[1]
    logits = linear(y3, p["out_w"], p["out_b"], out_dtype=jnp.float32)
    return logits.reshape(B, S, V)


def transformer_forward(params, enc_X, dec_X, valid_length=None, max_seq_len=None,
                        num_heads=4):
    """Mirrors transformer.forward(enc_X, dec_X, valid_length, max_seq_len)."""
    B, Se, D = enc_X.shape
    Sd = dec_X.shape[1]
    if valid_length is None:
        valid_length = jnp.full((B,), Se, dtype=jnp.int32)
    else:
        valid_length = valid_length.astype(jnp.int32)
    dec_valid = jnp.full((B,), Sd, dtype=jnp.int32)

    # pad sequence dims once at the model boundary; stay padded through the stack
    Sep, Sdp = _round_up(Se, 8), _round_up(Sd, 8)
    enc_Xp = _pad_dim(enc_X, 1, Sep)
    dec_Xp = _pad_dim(dec_X, 1, Sdp)

    pe_base = max_seq_len if max_seq_len is not None else Se
    enc_output = encoder_forward(params["enc"], enc_Xp, valid_length, pe_base,
                                 num_heads)
    state = decoder_init_state(enc_output, valid_length)
    output = decoder_forward(params["dec"], dec_Xp, state, num_heads,
                             dec_valid=dec_valid, pe_base=Sd)
    return output[:, :Sd]


# ----------------------------------------------------------------------------
# Deterministic parameter init (weights stored bf16, pre-fused; biases/LN f32)
# ----------------------------------------------------------------------------
def _dense_f32(key, din, dout):
    w = jax.random.normal(key, (din, dout), jnp.float32) * 0.02
    return w, jnp.zeros((dout,), jnp.float32)


def _attn_params(key, d, num_heads, cross):
    ks = jax.random.split(key, 4)
    wq, bq = _dense_f32(ks[0], d, d)
    wk, bk = _dense_f32(ks[1], d, d)
    wv, bv = _dense_f32(ks[2], d, d)
    wo, bo = _dense_f32(ks[3], d, d)
    # fold the 1/sqrt(Dh) attention scale into the q projection (free at runtime)
    scale = 1.0 / math.sqrt(d // num_heads)
    wq, bq = wq * scale, bq * scale
    if cross:
        return dict(wq=wq.astype(jnp.bfloat16), bq=bq,
                    wkv=jnp.concatenate([wk, wv], axis=1).astype(jnp.bfloat16),
                    bkv=jnp.concatenate([bk, bv]),
                    wo=wo.astype(jnp.bfloat16), bo=bo)
    return dict(wqkv=jnp.concatenate([wq, wk, wv], axis=1).astype(jnp.bfloat16),
                bqkv=jnp.concatenate([bq, bk, bv]),
                wo=wo.astype(jnp.bfloat16), bo=bo)


def init_params(key, d_model, ffn_hidden, vocab, num_heads):
    ke, kd = jax.random.split(key)
    ke = jax.random.split(ke, 3)
    kd = jax.random.split(kd, 5)
    ones = jnp.ones((d_model,), jnp.float32)
    zeros = jnp.zeros((d_model,), jnp.float32)

    enc = dict(
        attn=_attn_params(ke[0], d_model, num_heads, cross=False),
        ffn_w1=_dense_f32(ke[1], d_model, ffn_hidden)[0].astype(jnp.bfloat16),
        ffn_b1=jnp.zeros((ffn_hidden,), jnp.float32),
        ffn_w2=_dense_f32(ke[2], ffn_hidden, d_model)[0].astype(jnp.bfloat16),
        ffn_b2=zeros,
        ln1_g=ones, ln1_b=zeros, ln2_g=ones, ln2_b=zeros,
    )
    out_w, out_b = _dense_f32(kd[4], d_model, vocab)
    dec = dict(
        self_attn=_attn_params(kd[0], d_model, num_heads, cross=False),
        cross_attn=_attn_params(kd[1], d_model, num_heads, cross=True),
        ffn_w1=_dense_f32(kd[2], d_model, ffn_hidden)[0].astype(jnp.bfloat16),
        ffn_b1=jnp.zeros((ffn_hidden,), jnp.float32),
        ffn_w2=_dense_f32(kd[3], ffn_hidden, d_model)[0].astype(jnp.bfloat16),
        ffn_b2=zeros,
        ln1_g=ones, ln1_b=zeros, ln2_g=ones, ln2_b=zeros,
        ln3_g=ones, ln3_b=zeros,
        out_w=out_w.astype(jnp.bfloat16), out_b=out_b,
    )
    return dict(enc=enc, dec=dec)


# ----------------------------------------------------------------------------
if __name__ == "__main__":
    B, ENC_S, DEC_S, D, H, FFN, VOCAB = 2, 8, 8, 32, 4, 64, 32

    key = jax.random.PRNGKey(0)
    k_p, k_e, k_d = jax.random.split(key, 3)
    params = init_params(k_p, D, FFN, VOCAB, H)

    enc_X = jax.random.normal(k_e, (B, ENC_S, D), jnp.float32)
    dec_X = jax.random.normal(k_d, (B, DEC_S, D), jnp.float32)
    valid_length = jnp.array([5, 8], dtype=jnp.int32)

    fwd = jax.jit(functools.partial(transformer_forward,
                                    max_seq_len=ENC_S, num_heads=H))
    out = fwd(params, enc_X, dec_X, valid_length)
    out = jax.block_until_ready(out)
    assert out.shape == (B, DEC_S, VOCAB)
    assert jnp.all(jnp.isfinite(out))
    print("KERNEL_OK")
</pallas_src>

<mosaic_0001>
module attributes {stable_mosaic.version = 11 : i64} {
  func.func @_linear_kernel(%arg0: i32, %arg1: i32, %arg2: memref<8x32xbf16, #tpu.memory_space<vmem>>, %arg3: memref<32x128xbf16, #tpu.memory_space<vmem>>, %arg4: memref<1x128xf32, #tpu.memory_space<vmem>>, %arg5: memref<8x128xbf16, #tpu.memory_space<vmem>>) attributes {dimension_semantics = [#tpu.dimension_semantics<parallel>, #tpu.dimension_semantics<parallel>], iteration_bounds = array<i64: 2, 1>, scalar_prefetch = 0 : i64, scratch_operands = 0 : i64, tpu.core_type = #tpu.core_type<tc>, window_params = [{transform_indices = @transform_0, window_bounds = array<i64: 8, 32>}, {transform_indices = @transform_1, window_bounds = array<i64: 32, 128>}, {transform_indices = @transform_2, window_bounds = array<i64: 1, 128>}, {transform_indices = @transform_3, window_bounds = array<i64: 8, 128>}]} {
    %c0 = arith.constant 0 : index
    %c0_0 = arith.constant 0 : index
    %0 = vector.load %arg2[%c0, %c0_0] : memref<8x32xbf16, #tpu.memory_space<vmem>>, vector<8x32xbf16>
    %c0_1 = arith.constant 0 : index
    %c0_2 = arith.constant 0 : index
    %1 = vector.load %arg3[%c0_1, %c0_2] : memref<32x128xbf16, #tpu.memory_space<vmem>>, vector<32x128xbf16>
    %cst = arith.constant dense<0.000000e+00> : vector<8x128xf32>
    %2 = tpu.matmul %0, %1, %cst {dimension_numbers = #tpu.dot_dimension_numbers<[1], [0], [0], [1], [0, 0, 1, 1], [], []>} : vector<8x32xbf16>, vector<32x128xbf16>, vector<8x128xf32> -> vector<8x128xf32>
    %c0_3 = arith.constant 0 : index
    %c0_4 = arith.constant 0 : index
    %3 = vector.load %arg4[%c0_3, %c0_4] : memref<1x128xf32, #tpu.memory_space<vmem>>, vector<1x128xf32>
    %4 = vector.broadcast %3 : vector<1x128xf32> to vector<8x128xf32>
    %5 = arith.addf %2, %4 : vector<8x128xf32>
    %6 = arith.truncf %5 : vector<8x128xf32> to vector<8x128xbf16>
    %c0_5 = arith.constant 0 : index
    %c0_6 = arith.constant 0 : index
    %7 = vector.load %arg5[%c0_5, %c0_6] : memref<8x128xbf16, #tpu.memory_space<vmem>>, vector<8x128xbf16>
    tpu.vector_store %arg5[%c0_5, %c0_6], %6 {strides = array<i32>} : memref<8x128xbf16, #tpu.memory_space<vmem>>, vector<8x128xbf16>,
    return
  }
  func.func @transform_0(%arg0: i32, %arg1: i32) -> (i32, i32) {
    %c0_i32 = arith.constant 0 : i32
    %c0_i32_0 = arith.constant 0 : i32
    return %arg0, %c0_i32 : i32, i32
  }
  func.func @transform_1(%arg0: i32, %arg1: i32) -> (i32, i32) {
    %c0_i32 = arith.constant 0 : i32
    %c0_i32_0 = arith.constant 0 : i32
    return %c0_i32, %arg1 : i32, i32
  }
  func.func @transform_2(%arg0: i32, %arg1: i32) -> (i32, i32) {
    %c0_i32 = arith.constant 0 : i32
    %c0_i32_0 = arith.constant 0 : i32
    return %c0_i32, %arg1 : i32, i32
  }
  func.func @transform_3(%arg0: i32, %arg1: i32) -> (i32, i32) {
    %c0_i32 = arith.constant 0 : i32
    return %arg0, %arg1 : i32, i32
  }
}

module attributes {stable_mosaic.version = 11 : i64} {
  func.func @_flash_attn_kernel(%arg0: i32, %arg1: i32, %arg2: i32, %arg3: memref<2xi32, #tpu.memory_space<smem>>, %arg4: memref<4x8x8xbf16, #tpu.memory_space<vmem>>, %arg5: memref<4x8x8xbf16, #tpu.memory_space<vmem>>, %arg6: memref<4x8x8xbf16, #tpu.memory_space<vmem>>, %arg7: memref<4x8x8xbf16, #tpu.memory_space<vmem>>, %arg8: memref<4x8x1xf32, #tpu.memory_space<vmem>>, %arg9: memref<4x8x1xf32, #tpu.memory_space<vmem>>, %arg10: memref<4x8x8xf32, #tpu.memory_space<vmem>>) attributes {dimension_semantics = [#tpu.dimension_semantics<parallel>, #tpu.dimension_semantics<parallel>, #tpu.dimension_semantics<arbitrary>], iteration_bounds = array<i64: 2, 1, 1>, scalar_prefetch = 1 : i64, scratch_operands = 3 : i64, tpu.core_type = #tpu.core_type<tc>, window_params = [{transform_indices = @transform_0, window_bounds = array<i64: 4, 8, 8>}, {transform_indices = @transform_1, window_bounds = array<i64: 4, 8, 8>}, {transform_indices = @transform_2, window_bounds = array<i64: 4, 8, 8>}, {transform_indices = @transform_3, window_bounds = array<i64: 4, 8, 8>}]} {
    %c0_i32 = arith.constant 0 : i32
    %0 = arith.cmpi eq, %arg2, %c0_i32 : i32
    %1 = arith.extui %0 : i1 to i32
    %c0_i32_0 = arith.constant 0 : i32
    %2 = arith.cmpi ne, %1, %c0_i32_0 : i32
    scf.if %2 {
      %cst = arith.constant -1.000000e+30 : f32
      %16 = vector.broadcast %cst : f32 to vector<4x8x1xf32>
      %c0 = arith.constant 0 : index
      %c0_5 = arith.constant 0 : index
      %c0_6 = arith.constant 0 : index
      %17 = vector.load %arg8[%c0, %c0_5, %c0_6] : memref<4x8x1xf32, #tpu.memory_space<vmem>>, vector<4x8x1xf32>
      tpu.vector_store %arg8[%c0, %c0_5, %c0_6], %16 {strides = array<i32>} : memref<4x8x1xf32, #tpu.memory_space<vmem>>, vector<4x8x1xf32>,
      %cst_7 = arith.constant 0.000000e+00 : f32
      %18 = vector.broadcast %cst_7 : f32 to vector<4x8x1xf32>
      %c0_8 = arith.constant 0 : index
      %c0_9 = arith.constant 0 : index
      %c0_10 = arith.constant 0 : index
      %19 = vector.load %arg9[%c0_8, %c0_9, %c0_10] : memref<4x8x1xf32, #tpu.memory_space<vmem>>, vector<4x8x1xf32>
      tpu.vector_store %arg9[%c0_8, %c0_9, %c0_10], %18 {strides = array<i32>} : memref<4x8x1xf32, #tpu.memory_space<vmem>>, vector<4x8x1xf32>,
      %cst_11 = arith.constant 0.000000e+00 : f32
      %20 = vector.broadcast %cst_11 : f32 to vector<4x8x8xf32>
      %c0_12 = arith.constant 0 : index
      %c0_13 = arith.constant 0 : index
      %c0_14 = arith.constant 0 : index
      %21 = vector.load %arg10[%c0_12, %c0_13, %c0_14] : memref<4x8x8xf32, #tpu.memory_space<vmem>>, vector<4x8x8xf32>
      tpu.vector_store %arg10[%c0_12, %c0_13, %c0_14], %20 {strides = array<i32>} : memref<4x8x8xf32, #tpu.memory_space<vmem>>, vector<4x8x8xf32>,
    } else {
    }
    %3 = arith.index_cast %arg0 : i32 to index
    %4 = memref.load %arg3[%3] : memref<2xi32, #tpu.memory_space<smem>>
    %c8_i32 = arith.constant 8 : i32
    %5 = arith.muli %arg2, %c8_i32 : i32
    %6 = arith.cmpi slt, %5, %4 : i32
    %c8_i32_1 = arith.constant 8 : i32
    %7 = arith.muli %arg1, %c8_i32_1 : i32
    %c7_i32 = arith.constant 7 : i32
    %8 = arith.addi %7, %c7_i32 : i32
    %9 = arith.cmpi sle, %5, %8 : i32
    %10 = arith.andi %6, %9 : i1
    %11 = arith.extui %10 : i1 to i32
    %c0_i32_2 = arith.constant 0 : i32
    %12 = arith.cmpi ne, %11, %c0_i32_2 : i32
    scf.if %12 {
      %c0 = arith.constant 0 : index
      %c0_5 = arith.constant 0 : index
      %c0_6 = arith.constant 0 : index
      %16 = vector.load %arg4[%c0, %c0_5, %c0_6] : memref<4x8x8xbf16, #tpu.memory_space<vmem>>, vector<4x8x8xbf16>
      %c0_7 = arith.constant 0 : index
      %c0_8 = arith.constant 0 : index
      %c0_9 = arith.constant 0 : index
      %17 = vector.load %arg5[%c0_7, %c0_8, %c0_9] : memref<4x8x8xbf16, #tpu.memory_space<vmem>>, vector<4x8x8xbf16>
      %c0_10 = arith.constant 0 : index
      %c0_11 = arith.constant 0 : index
      %c0_12 = arith.constant 0 : index
      %18 = vector.load %arg6[%c0_10, %c0_11, %c0_12] : memref<4x8x8xbf16, #tpu.memory_space<vmem>>, vector<4x8x8xbf16>
      "tpu.trace_start"() <{level = 10 : i32, message = "hqd,hkd->hqk"}> : () -> ()
      %cst = arith.constant dense<0.000000e+00> : vector<4x8x8xf32>
      %19 = tpu.matmul %16, %17, %cst {dimension_numbers = #tpu.dot_dimension_numbers<[2], [2], [1], [1], [0, 0, 0, 1, 1, 1], [0], [0]>} : vector<4x8x8xbf16>, vector<4x8x8xbf16>, vector<4x8x8xf32> -> vector<4x8x8xf32>
      "tpu.trace_stop"() : () -> ()
      %20 = tpu.iota {dimensions = array<i32: 2>} : vector<1x8x8xi32>
      %21 = vector.broadcast %5 : i32 to vector<1x8x8xi32>
      %22 = arith.addi %21, %20 : vector<1x8x8xi32>
      %23 = vector.broadcast %4 : i32 to vector<1x8x8xi32>
      %24 = arith.cmpi slt, %22, %23 : vector<1x8x8xi32>
      %c8_i32_13 = arith.constant 8 : i32
      %25 = arith.muli %arg1, %c8_i32_13 : i32
      %26 = tpu.iota {dimensions = array<i32: 1>} : vector<1x8x8xi32>
      %27 = vector.broadcast %25 : i32 to vector<1x8x8xi32>
      %28 = arith.addi %27, %26 : vector<1x8x8xi32>
      %29 = arith.cmpi sle, %22, %28 : vector<1x8x8xi32>
      %30 = arith.andi %24, %29 : vector<1x8x8xi1>
      %cst_14 = arith.constant -1.000000e+30 : f32
      %31 = vector.shape_cast %30 : vector<1x8x8xi1> to vector<1x8x8xi1>
      %32 = vector.broadcast %31 : vector<1x8x8xi1> to vector<4x8x8xi1>
      %33 = vector.broadcast %cst_14 : f32 to vector<4x8x8xf32>
      %34 = arith.select %32, %19, %33 : vector<4x8x8xi1>, vector<4x8x8xf32>
      %c0_15 = arith.constant 0 : index
      %c0_16 = arith.constant 0 : index
      %c0_17 = arith.constant 0 : index
      %35 = vector.load %arg8[%c0_15, %c0_16, %c0_17] : memref<4x8x1xf32, #tpu.memory_space<vmem>>, vector<4x8x1xf32>
      %cst_18 = arith.constant dense<0xFF800000> : vector<4x8xf32>
      %36 = vector.multi_reduction <maximumf>, %34, %cst_18 [2] : vector<4x8x8xf32> to vector<4x8xf32>
      %37 = vector.shape_cast %36 : vector<4x8xf32> to vector<4x8x1xf32>
      %38 = arith.maximumf %35, %37 : vector<4x8x1xf32>
      %39 = arith.subf %35, %38 : vector<4x8x1xf32>
      %40 = math.exp %39 : vector<4x8x1xf32>
      %41 = vector.broadcast %38 : vector<4x8x1xf32> to vector<4x8x8xf32>
      %42 = arith.subf %34, %41 : vector<4x8x8xf32>
      %43 = math.exp %42 : vector<4x8x8xf32>
      %c0_19 = arith.constant 0 : index
      %c0_20 = arith.constant 0 : index
      %c0_21 = arith.constant 0 : index
      %44 = vector.load %arg9[%c0_19, %c0_20, %c0_21] : memref<4x8x1xf32, #tpu.memory_space<vmem>>, vector<4x8x1xf32>
      %45 = arith.mulf %40, %44 : vector<4x8x1xf32>
      %cst_22 = arith.constant dense<0.000000e+00> : vector<4x8xf32>
      %46 = vector.multi_reduction <add>, %43, %cst_22 [2] : vector<4x8x8xf32> to vector<4x8xf32>
      %47 = vector.shape_cast %46 : vector<4x8xf32> to vector<4x8x1xf32>
      %48 = arith.addf %45, %47 : vector<4x8x1xf32>
      %c0_23 = arith.constant 0 : index
      %c0_24 = arith.constant 0 : index
      %c0_25 = arith.constant 0 : index
      %49 = vector.load %arg9[%c0_23, %c0_24, %c0_25] : memref<4x8x1xf32, #tpu.memory_space<vmem>>, vector<4x8x1xf32>
      tpu.vector_store %arg9[%c0_23, %c0_24, %c0_25], %48 {strides = array<i32>} : memref<4x8x1xf32, #tpu.memory_space<vmem>>, vector<4x8x1xf32>,
      %c0_26 = arith.constant 0 : index
      %c0_27 = arith.constant 0 : index
      %c0_28 = arith.constant 0 : index
      %50 = vector.load %arg10[%c0_26, %c0_27, %c0_28] : memref<4x8x8xf32, #tpu.memory_space<vmem>>, vector<4x8x8xf32>
      %51 = vector.broadcast %40 : vector<4x8x1xf32> to vector<4x8x8xf32>
      %52 = arith.mulf %51, %50 : vector<4x8x8xf32>
      %53 = arith.truncf %43 : vector<4x8x8xf32> to vector<4x8x8xbf16>
      "tpu.trace_start"() <{level = 10 : i32, message = "hqk,hkd->hqd"}> : () -> ()
      %cst_29 = arith.constant dense<0.000000e+00> : vector<4x8x8xf32>
      %54 = tpu.matmul %53, %18, %cst_29 {dimension_numbers = #tpu.dot_dimension_numbers<[2], [1], [1], [2], [0, 0, 0, 1, 1, 2], [0], [0]>} : vector<4x8x8xbf16>, vector<4x8x8xbf16>, vector<4x8x8xf32> -> vector<4x8x8xf32>
      "tpu.trace_stop"() : () -> ()
      %55 = arith.addf %52, %54 : vector<4x8x8xf32>
      %c0_30 = arith.constant 0 : index
      %c0_31 = arith.constant 0 : index
      %c0_32 = arith.constant 0 : index
      %56 = vector.load %arg10[%c0_30, %c0_31, %c0_32] : memref<4x8x8xf32, #tpu.memory_space<vmem>>, vector<4x8x8xf32>
      tpu.vector_store %arg10[%c0_30, %c0_31, %c0_32], %55 {strides = array<i32>} : memref<4x8x8xf32, #tpu.memory_space<vmem>>, vector<4x8x8xf32>,
      %c0_33 = arith.constant 0 : index
      %c0_34 = arith.constant 0 : index
      %c0_35 = arith.constant 0 : index
      %57 = vector.load %arg8[%c0_33, %c0_34, %c0_35] : memref<4x8x1xf32, #tpu.memory_space<vmem>>, vector<4x8x1xf32>
      tpu.vector_store %arg8[%c0_33, %c0_34, %c0_35], %38 {strides = array<i32>} : memref<4x8x1xf32, #tpu.memory_space<vmem>>, vector<4x8x1xf32>,
    } else {
    }
    %c0_i32_3 = arith.constant 0 : i32
    %13 = arith.cmpi eq, %arg2, %c0_i32_3 : i32
    %14 = arith.extui %13 : i1 to i32
    %c0_i32_4 = arith.constant 0 : i32
    %15 = arith.cmpi ne, %14, %c0_i32_4 : i32
    scf.if %15 {
      %c0 = arith.constant 0 : index
      %c0_5 = arith.constant 0 : index
      %c0_6 = arith.constant 0 : index
      %16 = vector.load %arg9[%c0, %c0_5, %c0_6] : memref<4x8x1xf32, #tpu.memory_space<vmem>>, vector<4x8x1xf32>
      %cst = arith.constant 0.000000e+00 : f32
      %17 = vector.broadcast %cst : f32 to vector<4x8x1xf32>
      %18 = arith.cmpf ogt, %16, %17 : vector<4x8x1xf32>
      %cst_7 = arith.constant 1.000000e+00 : f32
      %19 = vector.broadcast %cst_7 : f32 to vector<4x8x1xf32>
      %20 = arith.select %18, %16, %19 : vector<4x8x1xi1>, vector<4x8x1xf32>
      %c0_8 = arith.constant 0 : index
      %c0_9 = arith.constant 0 : index
      %c0_10 = arith.constant 0 : index
      %21 = vector.load %arg10[%c0_8, %c0_9, %c0_10] : memref<4x8x8xf32, #tpu.memory_space<vmem>>, vector<4x8x8xf32>
      %22 = tpu.reciprocal %20 {approx = true} : vector<4x8x1xf32> -> vector<4x8x1xf32>
      %23 = vector.broadcast %22 : vector<4x8x1xf32> to vector<4x8x8xf32>
      %24 = arith.mulf %21, %23 : vector<4x8x8xf32>
      %25 = arith.truncf %24 : vector<4x8x8xf32> to vector<4x8x8xbf16>
      %c0_11 = arith.constant 0 : index
      %c0_12 = arith.constant 0 : index
      %c0_13 = arith.constant 0 : index
      %26 = vector.load %arg7[%c0_11, %c0_12, %c0_13] : memref<4x8x8xbf16, #tpu.memory_space<vmem>>, vector<4x8x8xbf16>
      tpu.vector_store %arg7[%c0_11, %c0_12, %c0_13], %25 {strides = array<i32>} : memref<4x8x8xbf16, #tpu.memory_space<vmem>>, vector<4x8x8xbf16>,
    } else {
    }
    return
  }
  func.func @transform_0(%arg0: i32, %arg1: i32, %arg2: i32, %arg3: memref<2xi32, #tpu.memory_space<smem>>) -> (i32, i32, i32) {
    %c0_i32 = arith.constant 0 : i32
    %c0_i32_0 = arith.constant 0 : i32
    return %arg0, %arg1, %c0_i32 : i32, i32, i32
  }
  func.func @transform_1(%arg0: i32, %arg1: i32, %arg2: i32, %arg3: memref<2xi32, #tpu.memory_space<smem>>) -> (i32, i32, i32) {
    %c0_i32 = arith.constant 0 : i32
    %c0_i32_0 = arith.constant 0 : i32
    return %arg0, %arg2, %c0_i32 : i32, i32, i32
  }
  func.func @transform_2(%arg0: i32, %arg1: i32, %arg2: i32, %arg3: memref<2xi32, #tpu.memory_space<smem>>) -> (i32, i32, i32) {
    %c0_i32 = arith.constant 0 : i32
    %c0_i32_0 = arith.constant 0 : i32
    return %arg0, %arg2, %c0_i32 : i32, i32, i32
  }
  func.func @transform_3(%arg0: i32, %arg1: i32, %arg2: i32, %arg3: memref<2xi32, #tpu.memory_space<smem>>) -> (i32, i32, i32) {
    %c0_i32 = arith.constant 0 : i32
    %c0_i32_0 = arith.constant 0 : i32
    return %arg0, %arg1, %c0_i32 : i32, i32, i32
  }
}

module attributes {stable_mosaic.version = 11 : i64} {
  func.func @_linear_ln_kernel(%arg0: i32, %arg1: memref<8x32xbf16, #tpu.memory_space<vmem>>, %arg2: memref<32x32xbf16, #tpu.memory_space<vmem>>, %arg3: memref<1x32xf32, #tpu.memory_space<vmem>>, %arg4: memref<8x32xbf16, #tpu.memory_space<vmem>>, %arg5: memref<1x32xf32, #tpu.memory_space<vmem>>, %arg6: memref<1x32xf32, #tpu.memory_space<vmem>>, %arg7: memref<8x32xbf16, #tpu.memory_space<vmem>>) attributes {dimension_semantics = [#tpu.dimension_semantics<parallel>], iteration_bounds = array<i64: 2>, scalar_prefetch = 0 : i64, scratch_operands = 0 : i64, tpu.core_type = #tpu.core_type<tc>, window_params = [{transform_indices = @transform_0, window_bounds = array<i64: 8, 32>}, {pipeline_mode = #tpu.pipeline_mode<synchronous>, transform_indices = @transform_1, window_bounds = array<i64: 32, 32>}, {pipeline_mode = #tpu.pipeline_mode<synchronous>, transform_indices = @transform_2, window_bounds = array<i64: 1, 32>}, {transform_indices = @transform_3, window_bounds = array<i64: 8, 32>}, {pipeline_mode = #tpu.pipeline_mode<synchronous>, transform_indices = @transform_4, window_bounds = array<i64: 1, 32>}, {pipeline_mode = #tpu.pipeline_mode<synchronous>, transform_indices = @transform_5, window_bounds = array<i64: 1, 32>}, {transform_indices = @transform_6, window_bounds = array<i64: 8, 32>}]} {
    %c0 = arith.constant 0 : index
    %c0_0 = arith.constant 0 : index
    %0 = vector.load %arg1[%c0, %c0_0] : memref<8x32xbf16, #tpu.memory_space<vmem>>, vector<8x32xbf16>
    %c0_1 = arith.constant 0 : index
    %c0_2 = arith.constant 0 : index
    %1 = vector.load %arg2[%c0_1, %c0_2] : memref<32x32xbf16, #tpu.memory_space<vmem>>, vector<32x32xbf16>
    %cst = arith.constant dense<0.000000e+00> : vector<8x32xf32>
    %2 = tpu.matmul %0, %1, %cst {dimension_numbers = #tpu.dot_dimension_numbers<[1], [0], [0], [1], [0, 0, 1, 1], [], []>} : vector<8x32xbf16>, vector<32x32xbf16>, vector<8x32xf32> -> vector<8x32xf32>
    %c0_3 = arith.constant 0 : index
    %c0_4 = arith.constant 0 : index
    %3 = vector.load %arg3[%c0_3, %c0_4] : memref<1x32xf32, #tpu.memory_space<vmem>>, vector<1x32xf32>
    %4 = vector.broadcast %3 : vector<1x32xf32> to vector<8x32xf32>
    %5 = arith.addf %2, %4 : vector<8x32xf32>
    %c0_5 = arith.constant 0 : index
    %c0_6 = arith.constant 0 : index
    %6 = vector.load %arg4[%c0_5, %c0_6] : memref<8x32xbf16, #tpu.memory_space<vmem>>, vector<8x32xbf16>
    %7 = arith.extf %6 : vector<8x32xbf16> to vector<8x32xf32>
    %8 = arith.addf %5, %7 : vector<8x32xf32>
    %cst_7 = arith.constant dense<0.000000e+00> : vector<8xf32>
    %9 = vector.multi_reduction <add>, %8, %cst_7 [1] : vector<8x32xf32> to vector<8xf32>
    %10 = vector.shape_cast %9 : vector<8xf32> to vector<8x1xf32>
    %cst_8 = arith.constant 3.200000e+01 : f32
    %11 = vector.broadcast %cst_8 : f32 to vector<8x1xf32>
    %12 = arith.divf %10, %11 : vector<8x1xf32>
    %13 = vector.broadcast %12 : vector<8x1xf32> to vector<8x32xf32>
    %14 = arith.subf %8, %13 : vector<8x32xf32>
    %15 = arith.mulf %14, %14 : vector<8x32xf32>
    %cst_9 = arith.constant dense<0.000000e+00> : vector<8xf32>
    %16 = vector.multi_reduction <add>, %15, %cst_9 [1] : vector<8x32xf32> to vector<8xf32>
    %17 = vector.shape_cast %16 : vector<8xf32> to vector<8x1xf32>
    %cst_10 = arith.constant 3.200000e+01 : f32
    %18 = vector.broadcast %cst_10 : f32 to vector<8x1xf32>
    %19 = arith.divf %17, %18 : vector<8x1xf32>
    %20 = vector.broadcast %12 : vector<8x1xf32> to vector<8x32xf32>
    %21 = arith.subf %8, %20 : vector<8x32xf32>
    %cst_11 = arith.constant 9.99999974E-6 : f32
    %22 = vector.broadcast %cst_11 : f32 to vector<8x1xf32>
    %23 = arith.addf %19, %22 : vector<8x1xf32>
    %24 = math.rsqrt %23 : vector<8x1xf32>
    %25 = vector.broadcast %24 : vector<8x1xf32> to vector<8x32xf32>
    %26 = arith.mulf %21, %25 : vector<8x32xf32>
    %c0_12 = arith.constant 0 : index
    %c0_13 = arith.constant 0 : index
    %27 = vector.load %arg5[%c0_12, %c0_13] : memref<1x32xf32, #tpu.memory_space<vmem>>, vector<1x32xf32>
    %28 = vector.broadcast %27 : vector<1x32xf32> to vector<8x32xf32>
    %29 = arith.mulf %26, %28 : vector<8x32xf32>
    %c0_14 = arith.constant 0 : index
    %c0_15 = arith.constant 0 : index
    %30 = vector.load %arg6[%c0_14, %c0_15] : memref<1x32xf32, #tpu.memory_space<vmem>>, vector<1x32xf32>
    %31 = vector.broadcast %30 : vector<1x32xf32> to vector<8x32xf32>
    %32 = arith.addf %29, %31 : vector<8x32xf32>
    %33 = arith.truncf %32 : vector<8x32xf32> to vector<8x32xbf16>
    %c0_16 = arith.constant 0 : index
    %c0_17 = arith.constant 0 : index
    %34 = vector.load %arg7[%c0_16, %c0_17] : memref<8x32xbf16, #tpu.memory_space<vmem>>, vector<8x32xbf16>
    tpu.vector_store %arg7[%c0_16, %c0_17], %33 {strides = array<i32>} : memref<8x32xbf16, #tpu.memory_space<vmem>>, vector<8x32xbf16>,
    return
  }
  func.func @transform_0(%arg0: i32) -> (i32, i32) {
    %c0_i32 = arith.constant 0 : i32
    %c0_i32_0 = arith.constant 0 : i32
    return %arg0, %c0_i32 : i32, i32
  }
  func.func @transform_1(%arg0: i32) -> (i32, i32) {
    %c0_i32 = arith.constant 0 : i32
    %c0_i32_0 = arith.constant 0 : i32
    %c0_i32_1 = arith.constant 0 : i32
    return %c0_i32, %c0_i32_0 : i32, i32
  }
  func.func @transform_2(%arg0: i32) -> (i32, i32) {
    %c0_i32 = arith.constant 0 : i32
    %c0_i32_0 = arith.constant 0 : i32
    %c0_i32_1 = arith.constant 0 : i32
    return %c0_i32, %c0_i32_0 : i32, i32
  }
  func.func @transform_3(%arg0: i32) -> (i32, i32) {
    %c0_i32 = arith.constant 0 : i32
    %c0_i32_0 = arith.constant 0 : i32
    return %arg0, %c0_i32 : i32, i32
  }
  func.func @transform_4(%arg0: i32) -> (i32, i32) {
    %c0_i32 = arith.constant 0 : i32
    %c0_i32_0 = arith.constant 0 : i32
    %c0_i32_1 = arith.constant 0 : i32
    return %c0_i32, %c0_i32_0 : i32, i32
  }
  func.func @transform_5(%arg0: i32) -> (i32, i32) {
    %c0_i32 = arith.constant 0 : i32
    %c0_i32_0 = arith.constant 0 : i32
    %c0_i32_1 = arith.constant 0 : i32
    return %c0_i32, %c0_i32_0 : i32, i32
  }
  func.func @transform_6(%arg0: i32) -> (i32, i32) {
    %c0_i32 = arith.constant 0 : i32
    %c0_i32_0 = arith.constant 0 : i32
    return %arg0, %c0_i32 : i32, i32
  }
}

module attributes {stable_mosaic.version = 11 : i64} {
  func.func @_flash_attn_kernel(%arg0: i32, %arg1: i32, %arg2: i32, %arg3: memref<2xi32, #tpu.memory_space<smem>>, %arg4: memref<4x8x8xbf16, #tpu.memory_space<vmem>>, %arg5: memref<4x8x8xbf16, #tpu.memory_space<vmem>>, %arg6: memref<4x8x8xbf16, #tpu.memory_space<vmem>>, %arg7: memref<4x8x8xbf16, #tpu.memory_space<vmem>>, %arg8: memref<4x8x1xf32, #tpu.memory_space<vmem>>, %arg9: memref<4x8x1xf32, #tpu.memory_space<vmem>>, %arg10: memref<4x8x8xf32, #tpu.memory_space<vmem>>) attributes {dimension_semantics = [#tpu.dimension_semantics<parallel>, #tpu.dimension_semantics<parallel>, #tpu.dimension_semantics<arbitrary>], iteration_bounds = array<i64: 2, 1, 1>, scalar_prefetch = 1 : i64, scratch_operands = 3 : i64, tpu.core_type = #tpu.core_type<tc>, window_params = [{transform_indices = @transform_0, window_bounds = array<i64: 4, 8, 8>}, {transform_indices = @transform_1, window_bounds = array<i64: 4, 8, 8>}, {transform_indices = @transform_2, window_bounds = array<i64: 4, 8, 8>}, {transform_indices = @transform_3, window_bounds = array<i64: 4, 8, 8>}]} {
    %c0_i32 = arith.constant 0 : i32
    %0 = arith.cmpi eq, %arg2, %c0_i32 : i32
    %1 = arith.extui %0 : i1 to i32
    %c0_i32_0 = arith.constant 0 : i32
    %2 = arith.cmpi ne, %1, %c0_i32_0 : i32
    scf.if %2 {
      %cst = arith.constant -1.000000e+30 : f32
      %12 = vector.broadcast %cst : f32 to vector<4x8x1xf32>
      %c0 = arith.constant 0 : index
      %c0_4 = arith.constant 0 : index
      %c0_5 = arith.constant 0 : index
      %13 = vector.load %arg8[%c0, %c0_4, %c0_5] : memref<4x8x1xf32, #tpu.memory_space<vmem>>, vector<4x8x1xf32>
      tpu.vector_store %arg8[%c0, %c0_4, %c0_5], %12 {strides = array<i32>} : memref<4x8x1xf32, #tpu.memory_space<vmem>>, vector<4x8x1xf32>,
      %cst_6 = arith.constant 0.000000e+00 : f32
      %14 = vector.broadcast %cst_6 : f32 to vector<4x8x1xf32>
      %c0_7 = arith.constant 0 : index
      %c0_8 = arith.constant 0 : index
      %c0_9 = arith.constant 0 : index
      %15 = vector.load %arg9[%c0_7, %c0_8, %c0_9] : memref<4x8x1xf32, #tpu.memory_space<vmem>>, vector<4x8x1xf32>
      tpu.vector_store %arg9[%c0_7, %c0_8, %c0_9], %14 {strides = array<i32>} : memref<4x8x1xf32, #tpu.memory_space<vmem>>, vector<4x8x1xf32>,
      %cst_10 = arith.constant 0.000000e+00 : f32
      %16 = vector.broadcast %cst_10 : f32 to vector<4x8x8xf32>
      %c0_11 = arith.constant 0 : index
      %c0_12 = arith.constant 0 : index
      %c0_13 = arith.constant 0 : index
      %17 = vector.load %arg10[%c0_11, %c0_12, %c0_13] : memref<4x8x8xf32, #tpu.memory_space<vmem>>, vector<4x8x8xf32>
      tpu.vector_store %arg10[%c0_11, %c0_12, %c0_13], %16 {strides = array<i32>} : memref<4x8x8xf32, #tpu.memory_space<vmem>>, vector<4x8x8xf32>,
    } else {
    }
    %3 = arith.index_cast %arg0 : i32 to index
    %4 = memref.load %arg3[%3] : memref<2xi32, #tpu.memory_space<smem>>
    %c8_i32 = arith.constant 8 : i32
    %5 = arith.muli %arg2, %c8_i32 : i32
    %6 = arith.cmpi slt, %5, %4 : i32
    %7 = arith.extui %6 : i1 to i32
    %c0_i32_1 = arith.constant 0 : i32
    %8 = arith.cmpi ne, %7, %c0_i32_1 : i32
    scf.if %8 {
      %c0 = arith.constant 0 : index
      %c0_4 = arith.constant 0 : index
      %c0_5 = arith.constant 0 : index
      %12 = vector.load %arg4[%c0, %c0_4, %c0_5] : memref<4x8x8xbf16, #tpu.memory_space<vmem>>, vector<4x8x8xbf16>
      %c0_6 = arith.constant 0 : index
      %c0_7 = arith.constant 0 : index
      %c0_8 = arith.constant 0 : index
      %13 = vector.load %arg5[%c0_6, %c0_7, %c0_8] : memref<4x8x8xbf16, #tpu.memory_space<vmem>>, vector<4x8x8xbf16>
      %c0_9 = arith.constant 0 : index
      %c0_10 = arith.constant 0 : index
      %c0_11 = arith.constant 0 : index
      %14 = vector.load %arg6[%c0_9, %c0_10, %c0_11] : memref<4x8x8xbf16, #tpu.memory_space<vmem>>, vector<4x8x8xbf16>
      "tpu.trace_start"() <{level = 10 : i32, message = "hqd,hkd->hqk"}> : () -> ()
      %cst = arith.constant dense<0.000000e+00> : vector<4x8x8xf32>
      %15 = tpu.matmul %12, %13, %cst {dimension_numbers = #tpu.dot_dimension_numbers<[2], [2], [1], [1], [0, 0, 0, 1, 1, 1], [0], [0]>} : vector<4x8x8xbf16>, vector<4x8x8xbf16>, vector<4x8x8xf32> -> vector<4x8x8xf32>
      "tpu.trace_stop"() : () -> ()
      %16 = tpu.iota {dimensions = array<i32: 2>} : vector<1x8x8xi32>
      %17 = vector.broadcast %5 : i32 to vector<1x8x8xi32>
      %18 = arith.addi %17, %16 : vector<1x8x8xi32>
      %19 = vector.broadcast %4 : i32 to vector<1x8x8xi32>
      %20 = arith.cmpi slt, %18, %19 : vector<1x8x8xi32>
      %cst_12 = arith.constant -1.000000e+30 : f32
      %21 = vector.shape_cast %20 : vector<1x8x8xi1> to vector<1x8x8xi1>
      %22 = vector.broadcast %21 : vector<1x8x8xi1> to vector<4x8x8xi1>
      %23 = vector.broadcast %cst_12 : f32 to vector<4x8x8xf32>
      %24 = arith.select %22, %15, %23 : vector<4x8x8xi1>, vector<4x8x8xf32>
      %c0_13 = arith.constant 0 : index
      %c0_14 = arith.constant 0 : index
      %c0_15 = arith.constant 0 : index
      %25 = vector.load %arg8[%c0_13, %c0_14, %c0_15] : memref<4x8x1xf32, #tpu.memory_space<vmem>>, vector<4x8x1xf32>
      %cst_16 = arith.constant dense<0xFF800000> : vector<4x8xf32>
      %26 = vector.multi_reduction <maximumf>, %24, %cst_16 [2] : vector<4x8x8xf32> to vector<4x8xf32>
      %27 = vector.shape_cast %26 : vector<4x8xf32> to vector<4x8x1xf32>
      %28 = arith.maximumf %25, %27 : vector<4x8x1xf32>
      %29 = arith.subf %25, %28 : vector<4x8x1xf32>
      %30 = math.exp %29 : vector<4x8x1xf32>
      %31 = vector.broadcast %28 : vector<4x8x1xf32> to vector<4x8x8xf32>
      %32 = arith.subf %24, %31 : vector<4x8x8xf32>
      %33 = math.exp %32 : vector<4x8x8xf32>
      %c0_17 = arith.constant 0 : index
      %c0_18 = arith.constant 0 : index
      %c0_19 = arith.constant 0 : index
      %34 = vector.load %arg9[%c0_17, %c0_18, %c0_19] : memref<4x8x1xf32, #tpu.memory_space<vmem>>, vector<4x8x1xf32>
      %35 = arith.mulf %30, %34 : vector<4x8x1xf32>
      %cst_20 = arith.constant dense<0.000000e+00> : vector<4x8xf32>
      %36 = vector.multi_reduction <add>, %33, %cst_20 [2] : vector<4x8x8xf32> to vector<4x8xf32>
      %37 = vector.shape_cast %36 : vector<4x8xf32> to vector<4x8x1xf32>
      %38 = arith.addf %35, %37 : vector<4x8x1xf32>
      %c0_21 = arith.constant 0 : index
      %c0_22 = arith.constant 0 : index
      %c0_23 = arith.constant 0 : index
      %39 = vector.load %arg9[%c0_21, %c0_22, %c0_23] : memref<4x8x1xf32, #tpu.memory_space<vmem>>, vector<4x8x1xf32>
      tpu.vector_store %arg9[%c0_21, %c0_22, %c0_23], %38 {strides = array<i32>} : memref<4x8x1xf32, #tpu.memory_space<vmem>>, vector<4x8x1xf32>,
      %c0_24 = arith.constant 0 : index
      %c0_25 = arith.constant 0 : index
      %c0_26 = arith.constant 0 : index
      %40 = vector.load %arg10[%c0_24, %c0_25, %c0_26] : memref<4x8x8xf32, #tpu.memory_space<vmem>>, vector<4x8x8xf32>
      %41 = vector.broadcast %30 : vector<4x8x1xf32> to vector<4x8x8xf32>
      %42 = arith.mulf %41, %40 : vector<4x8x8xf32>
      %43 = arith.truncf %33 : vector<4x8x8xf32> to vector<4x8x8xbf16>
      "tpu.trace_start"() <{level = 10 : i32, message = "hqk,hkd->hqd"}> : () -> ()
      %cst_27 = arith.constant dense<0.000000e+00> : vector<4x8x8xf32>
      %44 = tpu.matmul %43, %14, %cst_27 {dimension_numbers = #tpu.dot_dimension_numbers<[2], [1], [1], [2], [0, 0, 0, 1, 1, 2], [0], [0]>} : vector<4x8x8xbf16>, vector<4x8x8xbf16>, vector<4x8x8xf32> -> vector<4x8x8xf32>
      "tpu.trace_stop"() : () -> ()
      %45 = arith.addf %42, %44 : vector<4x8x8xf32>
      %c0_28 = arith.constant 0 : index
      %c0_29 = arith.constant 0 : index
      %c0_30 = arith.constant 0 : index
      %46 = vector.load %arg10[%c0_28, %c0_29, %c0_30] : memref<4x8x8xf32, #tpu.memory_space<vmem>>, vector<4x8x8xf32>
      tpu.vector_store %arg10[%c0_28, %c0_29, %c0_30], %45 {strides = array<i32>} : memref<4x8x8xf32, #tpu.memory_space<vmem>>, vector<4x8x8xf32>,
      %c0_31 = arith.constant 0 : index
      %c0_32 = arith.constant 0 : index
      %c0_33 = arith.constant 0 : index
      %47 = vector.load %arg8[%c0_31, %c0_32, %c0_33] : memref<4x8x1xf32, #tpu.memory_space<vmem>>, vector<4x8x1xf32>
      tpu.vector_store %arg8[%c0_31, %c0_32, %c0_33], %28 {strides = array<i32>} : memref<4x8x1xf32, #tpu.memory_space<vmem>>, vector<4x8x1xf32>,
    } else {
    }
    %c0_i32_2 = arith.constant 0 : i32
    %9 = arith.cmpi eq, %arg2, %c0_i32_2 : i32
    %10 = arith.extui %9 : i1 to i32
    %c0_i32_3 = arith.constant 0 : i32
    %11 = arith.cmpi ne, %10, %c0_i32_3 : i32
    scf.if %11 {
      %c0 = arith.constant 0 : index
      %c0_4 = arith.constant 0 : index
      %c0_5 = arith.constant 0 : index
      %12 = vector.load %arg9[%c0, %c0_4, %c0_5] : memref<4x8x1xf32, #tpu.memory_space<vmem>>, vector<4x8x1xf32>
      %cst = arith.constant 0.000000e+00 : f32
      %13 = vector.broadcast %cst : f32 to vector<4x8x1xf32>
      %14 = arith.cmpf ogt, %12, %13 : vector<4x8x1xf32>
      %cst_6 = arith.constant 1.000000e+00 : f32
      %15 = vector.broadcast %cst_6 : f32 to vector<4x8x1xf32>
      %16 = arith.select %14, %12, %15 : vector<4x8x1xi1>, vector<4x8x1xf32>
      %c0_7 = arith.constant 0 : index
      %c0_8 = arith.constant 0 : index
      %c0_9 = arith.constant 0 : index
      %17 = vector.load %arg10[%c0_7, %c0_8, %c0_9] : memref<4x8x8xf32, #tpu.memory_space<vmem>>, vector<4x8x8xf32>
      %18 = tpu.reciprocal %16 {approx = true} : vector<4x8x1xf32> -> vector<4x8x1xf32>
      %19 = vector.broadcast %18 : vector<4x8x1xf32> to vector<4x8x8xf32>
      %20 = arith.mulf %17, %19 : vector<4x8x8xf32>
      %21 = arith.truncf %20 : vector<4x8x8xf32> to vector<4x8x8xbf16>
      %c0_10 = arith.constant 0 : index
      %c0_11 = arith.constant 0 : index
      %c0_12 = arith.constant 0 : index
      %22 = vector.load %arg7[%c0_10, %c0_11, %c0_12] : memref<4x8x8xbf16, #tpu.memory_space<vmem>>, vector<4x8x8xbf16>
      tpu.vector_store %arg7[%c0_10, %c0_11, %c0_12], %21 {strides = array<i32>} : memref<4x8x8xbf16, #tpu.memory_space<vmem>>, vector<4x8x8xbf16>,
    } else {
    }
    return
  }
  func.func @transform_0(%arg0: i32, %arg1: i32, %arg2: i32, %arg3: memref<2xi32, #tpu.memory_space<smem>>) -> (i32, i32, i32) {
    %c0_i32 = arith.constant 0 : i32
    %c0_i32_0 = arith.constant 0 : i32
    return %arg0, %arg1, %c0_i32 : i32, i32, i32
  }
  func.func @transform_1(%arg0: i32, %arg1: i32, %arg2: i32, %arg3: memref<2xi32, #tpu.memory_space<smem>>) -> (i32, i32, i32) {
    %c0_i32 = arith.constant 0 : i32
    %c0_i32_0 = arith.constant 0 : i32
    return %arg0, %arg2, %c0_i32 : i32, i32, i32
  }
  func.func @transform_2(%arg0: i32, %arg1: i32, %arg2: i32, %arg3: memref<2xi32, #tpu.memory_space<smem>>) -> (i32, i32, i32) {
    %c0_i32 = arith.constant 0 : i32
    %c0_i32_0 = arith.constant 0 : i32
    return %arg0, %arg2, %c0_i32 : i32, i32, i32
  }
  func.func @transform_3(%arg0: i32, %arg1: i32, %arg2: i32, %arg3: memref<2xi32, #tpu.memory_space<smem>>) -> (i32, i32, i32) {
    %c0_i32 = arith.constant 0 : i32
    %c0_i32_0 = arith.constant 0 : i32
    return %arg0, %arg1, %c0_i32 : i32, i32, i32
  }
}

module attributes {stable_mosaic.version = 11 : i64} {
  func.func @_ffn_ln_kernel(%arg0: i32, %arg1: memref<8x32xbf16, #tpu.memory_space<vmem>>, %arg2: memref<32x64xbf16, #tpu.memory_space<vmem>>, %arg3: memref<1x64xf32, #tpu.memory_space<vmem>>, %arg4: memref<64x32xbf16, #tpu.memory_space<vmem>>, %arg5: memref<1x32xf32, #tpu.memory_space<vmem>>, %arg6: memref<1x32xf32, #tpu.memory_space<vmem>>, %arg7: memref<1x32xf32, #tpu.memory_space<vmem>>, %arg8: memref<8x32xbf16, #tpu.memory_space<vmem>>) attributes {dimension_semantics = [#tpu.dimension_semantics<parallel>], iteration_bounds = array<i64: 2>, scalar_prefetch = 0 : i64, scratch_operands = 0 : i64, tpu.core_type = #tpu.core_type<tc>, window_params = [{transform_indices = @transform_0, window_bounds = array<i64: 8, 32>}, {pipeline_mode = #tpu.pipeline_mode<synchronous>, transform_indices = @transform_1, window_bounds = array<i64: 32, 64>}, {pipeline_mode = #tpu.pipeline_mode<synchronous>, transform_indices = @transform_2, window_bounds = array<i64: 1, 64>}, {pipeline_mode = #tpu.pipeline_mode<synchronous>, transform_indices = @transform_3, window_bounds = array<i64: 64, 32>}, {pipeline_mode = #tpu.pipeline_mode<synchronous>, transform_indices = @transform_4, window_bounds = array<i64: 1, 32>}, {pipeline_mode = #tpu.pipeline_mode<synchronous>, transform_indices = @transform_5, window_bounds = array<i64: 1, 32>}, {pipeline_mode = #tpu.pipeline_mode<synchronous>, transform_indices = @transform_6, window_bounds = array<i64: 1, 32>}, {transform_indices = @transform_7, window_bounds = array<i64: 8, 32>}]} {
    %c0 = arith.constant 0 : index
    %c0_0 = arith.constant 0 : index
    %0 = vector.load %arg1[%c0, %c0_0] : memref<8x32xbf16, #tpu.memory_space<vmem>>, vector<8x32xbf16>
    %c0_1 = arith.constant 0 : index
    %c0_2 = arith.constant 0 : index
    %1 = vector.load %arg2[%c0_1, %c0_2] : memref<32x64xbf16, #tpu.memory_space<vmem>>, vector<32x64xbf16>
    %cst = arith.constant dense<0.000000e+00> : vector<8x64xf32>
    %2 = tpu.matmul %0, %1, %cst {dimension_numbers = #tpu.dot_dimension_numbers<[1], [0], [0], [1], [0, 0, 1, 1], [], []>} : vector<8x32xbf16>, vector<32x64xbf16>, vector<8x64xf32> -> vector<8x64xf32>
    %c0_3 = arith.constant 0 : index
    %c0_4 = arith.constant 0 : index
    %3 = vector.load %arg3[%c0_3, %c0_4] : memref<1x64xf32, #tpu.memory_space<vmem>>, vector<1x64xf32>
    %4 = vector.broadcast %3 : vector<1x64xf32> to vector<8x64xf32>
    %5 = arith.addf %2, %4 : vector<8x64xf32>
    %cst_5 = arith.constant 0.000000e+00 : f32
    %6 = vector.broadcast %cst_5 : f32 to vector<8x64xf32>
    %7 = arith.maximumf %5, %6 : vector<8x64xf32>
    %8 = arith.truncf %7 : vector<8x64xf32> to vector<8x64xbf16>
    %c0_6 = arith.constant 0 : index
    %c0_7 = arith.constant 0 : index
    %9 = vector.load %arg4[%c0_6, %c0_7] : memref<64x32xbf16, #tpu.memory_space<vmem>>, vector<64x32xbf16>
    %cst_8 = arith.constant dense<0.000000e+00> : vector<8x32xf32>
    %10 = tpu.matmul %8, %9, %cst_8 {dimension_numbers = #tpu.dot_dimension_numbers<[1], [0], [0], [1], [0, 0, 1, 1], [], []>} : vector<8x64xbf16>, vector<64x32xbf16>, vector<8x32xf32> -> vector<8x32xf32>
    %c0_9 = arith.constant 0 : index
    %c0_10 = arith.constant 0 : index
    %11 = vector.load %arg5[%c0_9, %c0_10] : memref<1x32xf32, #tpu.memory_space<vmem>>, vector<1x32xf32>
    %12 = vector.broadcast %11 : vector<1x32xf32> to vector<8x32xf32>
    %13 = arith.addf %10, %12 : vector<8x32xf32>
    %14 = arith.extf %0 : vector<8x32xbf16> to vector<8x32xf32>
    %15 = arith.addf %13, %14 : vector<8x32xf32>
    %cst_11 = arith.constant dense<0.000000e+00> : vector<8xf32>
    %16 = vector.multi_reduction <add>, %15, %cst_11 [1] : vector<8x32xf32> to vector<8xf32>
    %17 = vector.shape_cast %16 : vector<8xf32> to vector<8x1xf32>
    %cst_12 = arith.constant 3.200000e+01 : f32
    %18 = vector.broadcast %cst_12 : f32 to vector<8x1xf32>
    %19 = arith.divf %17, %18 : vector<8x1xf32>
    %20 = vector.broadcast %19 : vector<8x1xf32> to vector<8x32xf32>
    %21 = arith.subf %15, %20 : vector<8x32xf32>
    %22 = arith.mulf %21, %21 : vector<8x32xf32>
    %cst_13 = arith.constant dense<0.000000e+00> : vector<8xf32>
    %23 = vector.multi_reduction <add>, %22, %cst_13 [1] : vector<8x32xf32> to vector<8xf32>
    %24 = vector.shape_cast %23 : vector<8xf32> to vector<8x1xf32>
    %cst_14 = arith.constant 3.200000e+01 : f32
    %25 = vector.broadcast %cst_14 : f32 to vector<8x1xf32>
    %26 = arith.divf %24, %25 : vector<8x1xf32>
    %27 = vector.broadcast %19 : vector<8x1xf32> to vector<8x32xf32>
    %28 = arith.subf %15, %27 : vector<8x32xf32>
    %cst_15 = arith.constant 9.99999974E-6 : f32
    %29 = vector.broadcast %cst_15 : f32 to vector<8x1xf32>
    %30 = arith.addf %26, %29 : vector<8x1xf32>
    %31 = math.rsqrt %30 : vector<8x1xf32>
    %32 = vector.broadcast %31 : vector<8x1xf32> to vector<8x32xf32>
    %33 = arith.mulf %28, %32 : vector<8x32xf32>
    %c0_16 = arith.constant 0 : index
    %c0_17 = arith.constant 0 : index
    %34 = vector.load %arg6[%c0_16, %c0_17] : memref<1x32xf32, #tpu.memory_space<vmem>>, vector<1x32xf32>
    %35 = vector.broadcast %34 : vector<1x32xf32> to vector<8x32xf32>
    %36 = arith.mulf %33, %35 : vector<8x32xf32>
    %c0_18 = arith.constant 0 : index
    %c0_19 = arith.constant 0 : index
    %37 = vector.load %arg7[%c0_18, %c0_19] : memref<1x32xf32, #tpu.memory_space<vmem>>, vector<1x32xf32>
    %38 = vector.broadcast %37 : vector<1x32xf32> to vector<8x32xf32>
    %39 = arith.addf %36, %38 : vector<8x32xf32>
    %40 = arith.truncf %39 : vector<8x32xf32> to vector<8x32xbf16>
    %c0_20 = arith.constant 0 : index
    %c0_21 = arith.constant 0 : index
    %41 = vector.load %arg8[%c0_20, %c0_21] : memref<8x32xbf16, #tpu.memory_space<vmem>>, vector<8x32xbf16>
    tpu.vector_store %arg8[%c0_20, %c0_21], %40 {strides = array<i32>} : memref<8x32xbf16, #tpu.memory_space<vmem>>, vector<8x32xbf16>,
    return
  }
  func.func @transform_0(%arg0: i32) -> (i32, i32) {
    %c0_i32 = arith.constant 0 : i32
    %c0_i32_0 = arith.constant 0 : i32
    return %arg0, %c0_i32 : i32, i32
  }
  func.func @transform_1(%arg0: i32) -> (i32, i32) {
    %c0_i32 = arith.constant 0 : i32
    %c0_i32_0 = arith.constant 0 : i32
    %c0_i32_1 = arith.constant 0 : i32
    return %c0_i32, %c0_i32_0 : i32, i32
  }
  func.func @transform_2(%arg0: i32) -> (i32, i32) {
    %c0_i32 = arith.constant 0 : i32
    %c0_i32_0 = arith.constant 0 : i32
    %c0_i32_1 = arith.constant 0 : i32
    return %c0_i32, %c0_i32_0 : i32, i32
  }
  func.func @transform_3(%arg0: i32) -> (i32, i32) {
    %c0_i32 = arith.constant 0 : i32
    %c0_i32_0 = arith.constant 0 : i32
    %c0_i32_1 = arith.constant 0 : i32
    return %c0_i32, %c0_i32_0 : i32, i32
  }
  func.func @transform_4(%arg0: i32) -> (i32, i32) {
    %c0_i32 = arith.constant 0 : i32
    %c0_i32_0 = arith.constant 0 : i32
    %c0_i32_1 = arith.constant 0 : i32
    return %c0_i32, %c0_i32_0 : i32, i32
  }
  func.func @transform_5(%arg0: i32) -> (i32, i32) {
    %c0_i32 = arith.constant 0 : i32
    %c0_i32_0 = arith.constant 0 : i32
    %c0_i32_1 = arith.constant 0 : i32
    return %c0_i32, %c0_i32_0 : i32, i32
  }
  func.func @transform_6(%arg0: i32) -> (i32, i32) {
    %c0_i32 = arith.constant 0 : i32
    %c0_i32_0 = arith.constant 0 : i32
    %c0_i32_1 = arith.constant 0 : i32
    return %c0_i32, %c0_i32_0 : i32, i32
  }
  func.func @transform_7(%arg0: i32) -> (i32, i32) {
    %c0_i32 = arith.constant 0 : i32
    %c0_i32_0 = arith.constant 0 : i32
    return %arg0, %c0_i32 : i32, i32
  }
}

module attributes {stable_mosaic.version = 11 : i64} {
  func.func @_linear_kernel(%arg0: i32, %arg1: i32, %arg2: memref<8x32xbf16, #tpu.memory_space<vmem>>, %arg3: memref<32x128xbf16, #tpu.memory_space<vmem>>, %arg4: memref<1x128xf32, #tpu.memory_space<vmem>>, %arg5: memref<8x128xf32, #tpu.memory_space<vmem>>) attributes {dimension_semantics = [#tpu.dimension_semantics<parallel>, #tpu.dimension_semantics<parallel>], iteration_bounds = array<i64: 2, 1>, scalar_prefetch = 0 : i64, scratch_operands = 0 : i64, tpu.core_type = #tpu.core_type<tc>, window_params = [{transform_indices = @transform_0, window_bounds = array<i64: 8, 32>}, {transform_indices = @transform_1, window_bounds = array<i64: 32, 128>}, {transform_indices = @transform_2, window_bounds = array<i64: 1, 128>}, {transform_indices = @transform_3, window_bounds = array<i64: 8, 128>}]} {
    %c0 = arith.constant 0 : index
    %c0_0 = arith.constant 0 : index
    %0 = vector.load %arg2[%c0, %c0_0] : memref<8x32xbf16, #tpu.memory_space<vmem>>, vector<8x32xbf16>
    %c0_1 = arith.constant 0 : index
    %c0_2 = arith.constant 0 : index
    %1 = vector.load %arg3[%c0_1, %c0_2] : memref<32x128xbf16, #tpu.memory_space<vmem>>, vector<32x128xbf16>
    %cst = arith.constant dense<0.000000e+00> : vector<8x128xf32>
    %2 = tpu.matmul %0, %1, %cst {dimension_numbers = #tpu.dot_dimension_numbers<[1], [0], [0], [1], [0, 0, 1, 1], [], []>} : vector<8x32xbf16>, vector<32x128xbf16>, vector<8x128xf32> -> vector<8x128xf32>
    %c0_3 = arith.constant 0 : index
    %c0_4 = arith.constant 0 : index
    %3 = vector.load %arg4[%c0_3, %c0_4] : memref<1x128xf32, #tpu.memory_space<vmem>>, vector<1x128xf32>
    %4 = vector.broadcast %3 : vector<1x128xf32> to vector<8x128xf32>
    %5 = arith.addf %2, %4 : vector<8x128xf32>
    %c0_5 = arith.constant 0 : index
    %c0_6 = arith.constant 0 : index
    %6 = vector.load %arg5[%c0_5, %c0_6] : memref<8x128xf32, #tpu.memory_space<vmem>>, vector<8x128xf32>
    tpu.vector_store %arg5[%c0_5, %c0_6], %5 {strides = array<i32>} : memref<8x128xf32, #tpu.memory_space<vmem>>, vector<8x128xf32>,
    return
  }
  func.func @transform_0(%arg0: i32, %arg1: i32) -> (i32, i32) {
    %c0_i32 = arith.constant 0 : i32
    %c0_i32_0 = arith.constant 0 : i32
    return %arg0, %c0_i32 : i32, i32
  }
  func.func @transform_1(%arg0: i32, %arg1: i32) -> (i32, i32) {
    %c0_i32 = arith.constant 0 : i32
    %c0_i32_0 = arith.constant 0 : i32
    return %c0_i32, %arg1 : i32, i32
  }
  func.func @transform_2(%arg0: i32, %arg1: i32) -> (i32, i32) {
    %c0_i32 = arith.constant 0 : i32
    %c0_i32_0 = arith.constant 0 : i32
    return %c0_i32, %arg1 : i32, i32
  }
  func.func @transform_3(%arg0: i32, %arg1: i32) -> (i32, i32) {
    %c0_i32 = arith.constant 0 : i32
    return %arg0, %arg1 : i32, i32
  }
}

</mosaic_0001>

<bundles_post_ra>
// kernel: transformer_forward.17
= control target key start
LH: loop header
LB: loop body
LE: loop exit
PB: predicated region body
PF: predicated region fallthrough
CT: control target
= control target key end

     0   :  { %s487_s12 = smov 0   ;;  %s489_s13 = smov 0   ;;  %s529_s0 = inlined_call_operand.vmem [shape: bf16[16,32], index: 0, kind: input, shape index: {}]   ;;  %s530_s1 = inlined_call_operand.vmem [shape: bf16[32,128], index: 1, kind: input, shape index: {}]   ;;  %s531_s2 = inlined_call_operand.vmem [shape: f32[1,128], index: 2, kind: input, shape index: {}]   ;;  %s532_s3 = inlined_call_operand.vmem [shape: bf16[16,128], index: 3, kind: output, shape index: {}]  }
   0x1   :  { %s491_s14 = smov 0  }
   0x2 LB: > { %s25_s15 = sadd.s32 1, %s459_s13  ;;  %p393_p0 = scmp.ge.s32.totalorder %s463_s14, 1  ;;  %s463_s14 = sphi %s491_s14, %s13_s14   ;;  %s459_s13 = sphi %s489_s13, %s534_s13   ;;  %s455_s12 = sphi %s487_s12, %s533_s12  }
   0x3   : > { %p27_p1 = scmp.ge.s32.totalorder %s25_s15, 2  ;;  %p167_p2 = scmp.lt.s32.totalorder %s463_s14, 3 }
   0x5   : > { %s536_s15 = smov (%p27_p1, %s25_s15), 0  ;;  %p168_p3 = pnand %p393_p0, %p167_p2 }
   0x6   : > { %v439_v0 = vld [vmem:[%s530_s1] sm:$0xff] (!%p168_p3)   ;;  %v465_v1 = vmov (!%p168_p3), 0.0   ;;  %v440_v2 = vld [vmem:[%s530_s1 + $0x8] sm:$0xff] (!%p168_p3)   ;;  %vm466_vm0 = vmmov (!%p168_p3), 0   ;;  %p199_p4 = scmp.lt.s32.totalorder (!%p168_p3), %s455_s12, 1  ;;  %vm242_vm1 = vcmask (!%p168_p3), 261120  }
   0x7   : > { %171 = sbr.rel (%p168_p3) target bundleno = 235 (0xeb), region = 32  ;;  %405 = vmatprep.subr.bf16.mxu0 (!%p168_p3), %v465_v1  ;;  %409 = vmatprep.mubr.msk.bf16.mxu0 (!%p168_p3), %vm466_vm0, %v465_v1  ;;  %v396_v4 = vld [vmem:[%s531_s2] ss:$0 sm:$0xff] (!%p168_p3) }
   0x8   : > { %406 = vmatpush3.bf16.msra.mxu0 (!%p168_p3), %v439_v0 }
   0x9   : > { %407 = vmatprep.subr.bf16.mxu0 (!%p168_p3), %v465_v1 }
   0xc   : > { %408 = vmatpush3.bf16.msra.mxu0 (!%p168_p3), %v440_v2 }
   0xe   : > { %s538_s12 = smov (!%p199_p4, %s455_s12), 1 }
   0xf   : > { %s394_s20 = sshll.u32 %s538_s12, 2 }
  0x10   : > { %s202_s23 = scalar_lea.vmem %s529_s0, %s394_s20  ;;  %s216_s28 = scalar_lea.vmem %s532_s3, %s394_s20 }
  0x11   : > { %v218_v3 = vld [vmem:[%s202_s23] sm:$0xf] }
  0x12   : > { %410 = vmatmul.mubr.msk.bf16.vlgmr.msra.gmra.mrb[0].mxu0 %vm242_vm1, %v218_v3 }
  0xe5   : > { %v280_v5 = vpop.f32.mrb[0].mxu0 }
  0xe6   : > { %v281_v6 = vadd.f32 %v396_v4, %v280_v5  ;;  %v411_v7 = vpop.f32.mrb[1].mxu0 }
  0xe7   : > { %v283_v8 = vpop.f32.mrb[2].mxu0 }
  0xe8   : > { %v286_v9 = vpack.c.bf16 %v281_v6, %v281_v6  ;;  %v412_v10 = vpop.f32.mrb[3].mxu0 }
  0xea   : > { %287 = vst [vmem:[%s216_s28] sm:$0xf] %v286_v9 }
  0xeb PF: > { %s13_s14 = sadd.s32 1, %s463_s14   ;;  %s533_s12 = smov %s459_s13 }
  0xec   : > { %p10_p5 = scmp.ge.s32.totalorder %s13_s14, 4   ;;  %s534_s13 = smov %s536_s15 }
  0xee   :  { %12 = sbr.rel (!%p10_p5) target bundleno = 2 (0x2), region = 68 }

// kernel: transformer_forward.19
= control target key start
LH: loop header
LB: loop body
LE: loop exit
PB: predicated region body
PF: predicated region fallthrough
CT: control target
= control target key end

     0   :  { %s520_s21 = smov 0   ;;  %s563_s0 = inlined_call_operand.vmem [shape: bf16[16,32], index: 0, kind: input, shape index: {}]   ;;  %s564_s1 = inlined_call_operand.vmem [shape: bf16[32,32], index: 1, kind: input, shape index: {}]   ;;  %s565_s2 = inlined_call_operand.vmem [shape: f32[1,32], index: 2, kind: input, shape index: {}]   ;;  %s566_s3 = inlined_call_operand.vmem [shape: bf16[16,32], index: 3, kind: input, shape index: {}]   ;;  %s567_s4 = inlined_call_operand.vmem [shape: f32[1,32], index: 4, kind: input, shape index: {}]   ;;  %s568_s5 = inlined_call_operand.vmem [shape: f32[1,32], index: 5, kind: input, shape index: {}]   ;;  %s569_s6 = inlined_call_operand.vmem [shape: bf16[16,32], index: 6, kind: output, shape index: {}]  }
   0x1 LB: > { %s434_s22 = sadd.s32 4294967295, %s481_s21   ;;  %p438_p0 = scmp.ge.s32.totalorder %s481_s21, 1  ;;  %s481_s21 = sphi %s520_s21, %s16_s21  }
   0x2   : > { %p220_p1 = scmp.lt.s32.totalorder %s481_s21, 3 }
   0x4   : > { %p221_p2 = pnand %p438_p0, %p220_p1 }
   0x5   : > { %v471_v0 = vld [vmem:[%s564_s1] sm:$0xff] (!%p221_p2)   ;;  %v483_v1 = vmov (!%p221_p2), 0.0   ;;  %v472_v2 = vld [vmem:[%s564_s1 + $0x8] sm:$0xff] (!%p221_p2)   ;;  %vm484_vm0 = vmmov (!%p221_p2), 0   ;;  %p252_p3 = scmp.lt.s32.totalorder (!%p221_p2), %s434_s22, 1  ;;  %vm289_vm1 = vcmask (!%p221_p2), 261120  }
   0x6   : > { %224 = sbr.rel (%p221_p2) target bundleno = 549 (0x225), region = 44  ;;  %453 = vmatprep.subr.bf16.mxu0 (!%p221_p2), %v483_v1  ;;  %457 = vmatprep.mubr.msk.bf16.mxu0 (!%p221_p2), %vm484_vm0, %v483_v1  ;;  %v442_v5 = vld [vmem:[%s565_s2] ss:$0 sm:$0xff] (!%p221_p2)  ;;  %vm367_vm2 = vcmask (!%p221_p2), 257024  }
   0x7   : > { %454 = vmatpush3.bf16.msra.mxu0 (!%p221_p2), %v471_v0  ;;  %v446_v23 = vld [vmem:[%s567_s4] ss:$0 sm:$0xff] (!%p221_p2) }
   0x8   : > { %455 = vmatprep.subr.bf16.mxu0 (!%p221_p2), %v483_v1  ;;  %v447_v25 = vld [vmem:[%s568_s5] ss:$0 sm:$0xff] (!%p221_p2) }
   0xb   : > { %456 = vmatpush3.bf16.msra.mxu0 (!%p221_p2), %v472_v2 }
   0xd   : > { %s571_s22 = smov (!%p252_p3, %s434_s22), 1 }
   0xe   : > { %s534_s27 = sshll.u32 %s571_s22, 2 }
   0xf   : > { %s255_s30 = scalar_lea.vmem %s563_s0, %s534_s27  ;;  %s259_s9 = scalar_lea.vmem %s566_s3, %s534_s27 }
  0x10   : > { %v265_v3 = vld [vmem:[%s255_s30] sm:$0xf]  ;;  %s263_s18 = scalar_lea.vmem %s569_s6, %s534_s27 }
  0x11   : > { %458 = vmatmul.mubr.msk.bf16.vlgmr.msra.gmra.mrb[0].mxu0 %vm289_vm1, %v265_v3  ;;  %v333_v4 = vld [vmem:[%s259_s9] sm:$0xf] }
  0x12   : > { %v334_v6 = vunpack.c.l.bf16 %v333_v4 }
  0xe4   : > { %v327_v7 = vpop.f32.mrb[0].mxu0 }
  0xe5   : > { %v328_v8 = vadd.f32 %v442_v5, %v327_v7  ;;  %v459_v9 = vpop.f32.mrb[1].mxu0 }
  0xe6   : > { %v330_v10 = vpop.f32.mrb[2].mxu0 }
  0xe7   : > { %v460_v11 = vpop.f32.mrb[3].mxu0  ;;  %v335_v12 = vadd.f32 %v334_v6, %v328_v8 }
  0xe9   : > { %v336_v13 = vsel %vm289_vm1, %v335_v12, 0.0 }
  0xea   : > { %337 = vadd.xlane.f32.xlu0 %v336_v13 }
 0x177   : > { %v338_v14 = vpop.xlane.xlu0 %337 }
 0x178   : > { %v340_v15 = vmul.f32 0.03125, %v338_v14 }
 0x17a   : > { %v341_v16 = vsub.f32 %v335_v12, %v340_v15 }
 0x17c   : > { %v342_v17 = vmul.f32 %v341_v16, %v341_v16 }
 0x17e   : > { %v343_v18 = vsel %vm289_vm1, %v342_v17, 0.0 }
 0x17f   : > { %344 = vadd.xlane.f32.xlu0 %v343_v18 }
 0x20c   : > { %v345_v19 = vpop.xlane.xlu0 %344 }
 0x20d   : > { %v346_v20 = vmul.f32 0.03125, %v345_v19 }
 0x20f   : > { %v347_v21 = vadd.f32 1e-05, %v346_v20 }
 0x211   : > { %473 = vrsqrt.f32 %v347_v21 }
 0x21b   : > { %v474_v22 = vpop.eup %473 }
 0x21c   : > { %v349_v24 = vmul.f32 %v474_v22, %v341_v16 }
 0x21e   : > { %v357_v26 = vmul.f32 %v446_v23, %v349_v24 }
 0x220   : > { %v365_v27 = vadd.f32 %v447_v25, %v357_v26 }
 0x222   : > { %v366_v28 = vpack.c.bf16 %v365_v27, %v365_v27 }
 0x224   : > { %368 = vst.msk [vmem:[%s263_s18] sm:$0xf] %vm367_vm2, %v366_v28 }
 0x225 PF: > { %s16_s21 = sadd.s32 1, %s481_s21  }
 0x226   : > { %p13_p4 = scmp.ge.s32.totalorder %s16_s21, 4  }
 0x228   :  { %15 = sbr.rel (!%p13_p4) target bundleno = 1 (0x1), region = 77 }

// kernel: transformer_forward.18
= control target key start
LH: loop header
LB: loop body
LE: loop exit
PB: predicated region body
PF: predicated region fallthrough
CT: control target
= control target key end

     0   :  { %s1435_s0 = inlined_call_operand.vmem [shape: s32[2], index: 0, kind: input, shape index: {}]   ;;  %s1436_s1 = inlined_call_operand.vmem [shape: bf16[8,8,8], index: 1, kind: input, shape index: {}]   ;;  %s1437_s2 = inlined_call_operand.vmem [shape: bf16[8,8,8], index: 2, kind: input, shape index: {}]   ;;  %s1438_s3 = inlined_call_operand.vmem [shape: bf16[8,8,8], index: 3, kind: input, shape index: {}]   ;;  %s1439_s4 = inlined_call_operand.vmem [shape: bf16[8,8,8], index: 4, kind: output, shape index: {}]  }
   0x1   :  { %s9_s17 = sshll.u32 %s1435_s0, 4  ;;  %s10_s17 = int_to_ptr.vmem [resolvable:$true] %s9_s17 }
   0x2   :  { %s1167_s18 = scalar_lea.vmem %s10_s17, 16  ;;  %p1172_p1 = scmp.lt.s32.totalorder %s10_s17, %s10_s17 }
   0x3   :  { %p1168_p0 = scmp.ne.s32.totalorder %s10_s17, %s1167_s18  ;;  %p1173_p2 = scmp.lt.s32.totalorder %s1167_s18, %s1167_s18 }
   0x5   :  { %p1174_p3 = por %p1173_p2, %p1172_p1 }
   0x7   :  { %p1175_p4 = pnand %p1174_p3, %p1168_p0 }
   0x9   :  { %1178 = shalt.err (!%p1175_p4)  }
   0xa   :  { %s1205_s19 = smov [#allocation6]  }
   0xb   :  { %12 = dma.vmem_to_smem %s10_s17, 16, %s1205_s19, [#allocation5] }
   0xc   :  { %1191 = dma.done.wait [#allocation5], 16 }
   0xd   :  { %1192 = vsyncadd [#allocation5], 4294967280 }
   0xe   :  { %14 = sfence }
   0xf   :  { %s1240_s20 = smov 0   ;;  %s1242_s21 = smov 0  }
  0x10   :  { %s1244_s22 = smov 0  }
  0x11 LB: > { %s39_s0 = sadd.s32 1, %s1199_s21  ;;  %p1022_p5 = scmp.ge.s32.totalorder %s1203_s22, 1  ;;  %s1203_s22 = sphi %s1244_s22, %s20_s22   ;;  %s1199_s21 = sphi %s1242_s21, %s1444_s21   ;;  %s1195_s20 = sphi %s1240_s20, %s1443_s20  }
  0x12   : > { %p41_p6 = scmp.ge.s32.totalorder %s39_s0, 2  ;;  %p203_p7 = scmp.lt.s32.totalorder %s1203_s22, 3 }
  0x14   : > { %s1446_s0 = smov (%p41_p6, %s39_s0), 0  ;;  %p204_p8 = pnand %p1022_p5, %p203_p7 }
  0x15   : > { %s1023_s23 = sshll.u32 (!%p204_p8), %s1195_s20, 2  ;;  %vm290_vm0 = vcmask (!%p204_p8), 7168   ;;  %s1262_s24 = sld [smem:[#allocation6 + %s1195_s20]] (!%p204_p8)  ;;  %v1206_v0 = vmov (!%p204_p8), -1e+30   ;;  %v1207_v1 = vmov (!%p204_p8), 0.0  }
  0x16   : > { %207 = sbr.rel (%p204_p8) target bundleno = 923 (0x39b), region = 32  ;;  %p1264_p9 = scmp.lt.s32.totalorder (!%p204_p8), %s1023_s23, 7  ;;  %291 = vst.msk [vmem:[#allocation2] sm:$0xff] (!%p204_p8), %vm290_vm0, %v1206_v0  ;;  %292 = vst.msk [vmem:[#allocation2 + $0x8] sm:$0xff] (!%p204_p8), %vm290_vm0, %v1206_v0  ;;  %vm299_vm1 = vcmask (!%p204_p8), 64512  }
  0x17   : > { %293 = vst.msk [vmem:[#allocation2 + $0x10] sm:$0xff] (!%p204_p8), %vm290_vm0, %v1206_v0  ;;  %294 = vst.msk [vmem:[#allocation2 + $0x18] sm:$0xff] (!%p204_p8), %vm290_vm0, %v1206_v0 }
  0x18   : > { %295 = vst.msk [vmem:[#allocation3] sm:$0xff] (!%p204_p8), %vm290_vm0, %v1207_v1  ;;  %296 = vst.msk [vmem:[#allocation3 + $0x8] sm:$0xff] (!%p204_p8), %vm290_vm0, %v1207_v1 }
  0x19   : > { %297 = vst.msk [vmem:[#allocation3 + $0x10] sm:$0xff] (!%p204_p8), %vm290_vm0, %v1207_v1  ;;  %298 = vst.msk [vmem:[#allocation3 + $0x18] sm:$0xff] (!%p204_p8), %vm290_vm0, %v1207_v1 }
  0x1a   : > { %300 = vst.msk [vmem:[#allocation4] sm:$0xff] (!%p204_p8), %vm299_vm1, %v1207_v1  ;;  %301 = vst.msk [vmem:[#allocation4 + $0x8] sm:$0xff] (!%p204_p8), %vm299_vm1, %v1207_v1 }
  0x1b   : > { %302 = vst.msk [vmem:[#allocation4 + $0x10] sm:$0xff] (!%p204_p8), %vm299_vm1, %v1207_v1  ;;  %303 = vst.msk [vmem:[#allocation4 + $0x18] sm:$0xff] (!%p204_p8), %vm299_vm1, %v1207_v1  ;;  %p1031_p10 = scmp.gt.s32.totalorder (!%p204_p8), %s1262_s24, 0 }
  0x1d   : > { %s1448_s23 = smov (!%p1264_p9, %s1023_s23), 7  ;;  %313 = sbr.rel (!%p1031_p10) target bundleno = 771 (0x303), region = 40 }
  0x1e   : > { %s1024_s26 = sshll.u32 %s1448_s23, 2  ;;  %v1208_v4 = vmov (%p1031_p10), 0.0   ;;  %vm1209_vm2 = vmmov (%p1031_p10), 0   ;;  %v511_v15 = vlaneseq (%p1031_p10)  ;;  %v515_v18 = vstv (%p1031_p10), %s1262_s24  ;;  %v529_v45 = vld [vmem:[#allocation2] sm:$0xff] (%p1031_p10)  ;;  %v1357_v48 = vld [vmem:[#allocation2 + $0x8] sm:$0xff] (%p1031_p10)  ;;  %v531_v53 = vld [vmem:[#allocation2 + $0x10] sm:$0xff] (%p1031_p10) }
  0x1f   : > { %s1285_s29 = scalar_lea.vmem %s1436_s1, %s1024_s26  ;;  %s265_s6 = scalar_lea.vmem %s1437_s2, %s1024_s26  ;;  %1060 = vmatprep.subr.bf16.mxu0 (%p1031_p10), %v1208_v4  ;;  %1066 = vmatprep.subr.bf16.mxu1 (%p1031_p10), %v1208_v4  ;;  %v1210_v44 = vmov (%p1031_p10), 0   ;;  %v1368_v57 = vld [vmem:[#allocation2 + $0x18] sm:$0xff] (%p1031_p10)  ;;  %vm657_vm6 = vcmask (%p1031_p10), 1043456  }
  0x20   : > { %s1293_s9 = scalar_lea.vmem %s1438_s3, %s1024_s26  ;;  %s1298_s12 = scalar_lea.vmem %s1439_s4, %s1024_s26  ;;  %v318_v2 = vld [vmem:[%s265_s6] sm:$0xf] (%p1031_p10)  ;;  %v319_v3 = vld [vmem:[%s265_s6 + $0x4] sm:$0xf] (%p1031_p10)  ;;  %1062 = vmatprep.mubr.msk.bf16.mxu0 (%p1031_p10), %vm1209_vm2, %v1208_v4  ;;  %1068 = vmatprep.mubr.msk.bf16.mxu1 (%p1031_p10), %vm1209_vm2, %v1208_v4  ;;  %v320_v7 = vld [vmem:[%s265_s6 + $0x8] sm:$0xf] (%p1031_p10) }
  0x21   : > { %v331_v5 = vsel (%p1031_p10), %vm299_vm1, %v318_v2, 0  ;;  %v377_v6 = vsel (%p1031_p10), %vm299_vm1, %v319_v3, 0  ;;  %v321_v8 = vld [vmem:[%s265_s6 + $0xc] sm:$0xf] (%p1031_p10)  ;;  %v314_v9 = vld [vmem:[%s1285_s29] sm:$0xf] (%p1031_p10)  ;;  %1139 = vset.pattern.permute.xlu0 (%p1031_p10), %v1210_v44  ;;  %1140 = vset.pattern.permute.xlu1 (%p1031_p10), %v1210_v44 }
  0x22   : > { %1061 = vmatpush3.bf16.xpose.msra.mxu0 (%p1031_p10), %v331_v5  ;;  %1067 = vmatpush3.bf16.xpose.msra.mxu1 (%p1031_p10), %v377_v6  ;;  %v315_v10 = vld [vmem:[%s1285_s29 + $0x4] sm:$0xf] (%p1031_p10)  ;;  %v423_v11 = vsel (%p1031_p10), %vm299_vm1, %v320_v7, 0  ;;  %v469_v12 = vsel (%p1031_p10), %vm299_vm1, %v321_v8, 0  ;;  %v316_v13 = vld [vmem:[%s1285_s29 + $0x8] sm:$0xf] (%p1031_p10) }
  0x23   : > { %1072 = vmatprep.subr.bf16.mxu0 (%p1031_p10), %v1208_v4  ;;  %1078 = vmatprep.subr.bf16.mxu1 (%p1031_p10), %v1208_v4  ;;  %v317_v14 = vld [vmem:[%s1285_s29 + $0xc] sm:$0xf] (%p1031_p10)  ;;  %v512_v16 = vand.u32 (%p1031_p10), 127, %v511_v15  ;;  %v518_v17 = vshrl.u32 (%p1031_p10), %v511_v15, 7  ;;  %v322_v62 = vld [vmem:[%s1293_s9] sm:$0xf] (%p1031_p10) }
  0x24   : > { %v659_v63 = vsel %vm657_vm6, %v322_v62, 0  ;;  %v323_v1 = vld [vmem:[%s1293_s9 + $0x4] sm:$0xf]  ;;  %v324_v15 = vld [vmem:[%s1293_s9 + $0x8] sm:$0xf] }
  0x25   : > { %vm516_vm3 = vcmp.lt.s32.totalorder %v512_v16, %v515_v18  ;;  %vm521_vm4 = vcmp.le.s32.totalorder %v512_v16, %v518_v17  ;;  %v705_v2 = vsel %vm657_vm6, %v323_v1, 0  ;;  %v624_v1 = vld [vmem:[#allocation4 + $0x10] sm:$0xff] }
  0x26   : > { %vm1332_vm5 = vmand %vm516_vm3, %vm521_vm4 }
  0x29   : > { %1063 = vmatmul.mubr.msk.bf16.vlgmr.msra.gmra.mrb[0].mxu0 %vm299_vm1, %v314_v9  ;;  %1069 = vmatmul.mubr.msk.bf16.vlgmr.msra.gmra.mrb[0].mxu1 %vm299_vm1, %v315_v10 }
  0x2a   : > { %1073 = vmatpush3.bf16.xpose.msra.mxu0 %v423_v11  ;;  %1079 = vmatpush3.bf16.xpose.msra.mxu1 %v469_v12 }
  0x2b   : > { %1074 = vmatprep.mubr.msk.bf16.mxu0 %vm1209_vm2, %v1208_v4  ;;  %1080 = vmatprep.mubr.msk.bf16.mxu1 %vm1209_vm2, %v1208_v4 }
  0x2c   : > { %1084 = vmatprep.subr.bf16.mxu0 %v1208_v4  ;;  %1090 = vmatprep.subr.bf16.mxu1 %v1208_v4 }
  0x31   : > { %1075 = vmatmul.mubr.msk.bf16.vlgmr.msra.gmra.mrb[4].mxu0 %vm299_vm1, %v316_v13  ;;  %1081 = vmatmul.mubr.msk.bf16.vlgmr.msra.gmra.mrb[4].mxu1 %vm299_vm1, %v317_v14 }
  0x32   : > { %1086 = vmatprep.mubr.msk.bf16.mxu0 %vm1209_vm2, %v1208_v4  ;;  %1092 = vmatprep.mubr.msk.bf16.mxu1 %vm1209_vm2, %v1208_v4 }
  0x33   : > { %1085 = vmatpush3.bf16.msra.mxu0 %v659_v63  ;;  %1091 = vmatpush3.bf16.msra.mxu1 %v705_v2 }
  0x34   : > { %1096 = vmatprep.subr.bf16.mxu0 %v1208_v4  ;;  %1102 = vmatprep.subr.bf16.mxu1 %v1208_v4 }
  0xfc   : > { %v367_v20 = vpop.f32.mrb[0].mxu0  ;;  %v413_v21 = vpop.f32.mrb[0].mxu1 }
  0xfd   : > { %v1338_v22 = vsel %vm1332_vm5, %v367_v20, -1e+30  ;;  %v1064_v23 = vpop.f32.mrb[1].mxu0  ;;  %v1342_v24 = vsel %vm1332_vm5, %v413_v21, -1e+30  ;;  %v1070_v25 = vpop.f32.mrb[1].mxu1 }
  0xfe   : > { %v370_v26 = vpop.f32.mrb[2].mxu0  ;;  %v533_v27 = vsel %vm299_vm1, %v1338_v22, -inf  ;;  %v416_v28 = vpop.f32.mrb[2].mxu1  ;;  %v536_v31 = vsel %vm299_vm1, %v1342_v24, -inf  ;;  %v751_v20 = vsel %vm657_vm6, %v324_v15, 0 }
  0xff   : > { %534 = vmax.xlane.f32.xlu0 %v533_v27  ;;  %v1065_v29 = vpop.f32.mrb[3].mxu0  ;;  %v1071_v30 = vpop.f32.mrb[3].mxu1  ;;  %v325_v21 = vld [vmem:[%s1293_s9 + $0xc] sm:$0xf] }
 0x100   : > { %v797_v26 = vsel %vm657_vm6, %v325_v21, 0 }
 0x103   : > { %537 = vmax.xlane.f32.xlu0 %v536_v31 }
 0x104   : > { %v459_v32 = vpop.f32.mrb[4].mxu0  ;;  %v505_v33 = vpop.f32.mrb[4].mxu1 }
 0x105   : > { %v527_v34 = vsel %vm1332_vm5, %v459_v32, -1e+30  ;;  %v1076_v35 = vpop.f32.mrb[5].mxu0  ;;  %v1352_v36 = vsel %vm1332_vm5, %v505_v33, -1e+30  ;;  %v1082_v37 = vpop.f32.mrb[5].mxu1 }
 0x106   : > { %v462_v38 = vpop.f32.mrb[6].mxu0  ;;  %v539_v39 = vsel %vm299_vm1, %v527_v34, -inf  ;;  %v508_v40 = vpop.f32.mrb[6].mxu1  ;;  %v542_v43 = vsel %vm299_vm1, %v1352_v36, -inf }
 0x107   : > { %540 = vmax.xlane.f32.xlu1 %v539_v39  ;;  %v1077_v41 = vpop.f32.mrb[7].mxu0  ;;  %v1083_v42 = vpop.f32.mrb[7].mxu1  ;;  %v593_v38 = vld [vmem:[#allocation3] sm:$0xff] }
 0x108   : > { %v594_v41 = vld [vmem:[#allocation3 + $0x8] sm:$0xff] }
 0x10b   : > { %543 = vmax.xlane.f32.xlu1 %v542_v43 }
 0x18c   : > { %v535_v46 = vpop.xlane.xlu0 %534 }
 0x18d   : > { %v545_v47 = vmax.f32 %v529_v45, %v535_v46 }
 0x18f   : > { %v549_v49 = vsub.f32 %v529_v45, %v545_v47  ;;  %847 = vst.msk [vmem:[#allocation2] sm:$0xff] %vm290_vm0, %v545_v47  ;;  %563 = vperm.xlu0 %1139, %v545_v47   ;;  %v595_v47 = vld [vmem:[#allocation3 + $0x10] sm:$0xff] }
 0x190   : > { %v538_v50 = vpop.xlane.xlu0 %537 }
 0x191   : > { %v553_v51 = vmul.f32 1.442695, %v549_v49  ;;  %v1361_v52 = vmax.f32 %v1357_v48, %v538_v50  ;;  %v596_v50 = vld [vmem:[#allocation3 + $0x18] sm:$0xff] }
 0x193   : > { %1141 = vpow2.f32 %v553_v51  ;;  %v550_v54 = vsub.f32 %v1357_v48, %v1361_v52  ;;  %848 = vst.msk [vmem:[#allocation2 + $0x8] sm:$0xff] %vm290_vm0, %v1361_v52  ;;  %568 = vperm.xlu1 %1140, %v1361_v52  }
 0x194   : > { %v541_v55 = vpop.xlane.xlu1 %540 }
 0x195   : > { %v547_v56 = vmax.f32 %v531_v53, %v541_v55  ;;  %v555_v30 = vmul.f32 1.442695, %v550_v54  ;;  %v622_v55 = vld [vmem:[#allocation4] sm:$0xff] }
 0x197   : > { %v551_v58 = vsub.f32 %v531_v53, %v547_v56  ;;  %849 = vst.msk [vmem:[#allocation2 + $0x10] sm:$0xff] %vm290_vm0, %v547_v56  ;;  %573 = vperm.xlu1 %1140, %v547_v56  }
 0x198   : > { %v544_v59 = vpop.xlane.xlu1 %543 }
 0x199   : > { %v1372_v60 = vmax.f32 %v1368_v57, %v544_v59  ;;  %v557_v23 = vmul.f32 1.442695, %v551_v58 }
 0x19b   : > { %v552_v61 = vsub.f32 %v1368_v57, %v1372_v60  ;;  %850 = vst.msk [vmem:[#allocation2 + $0x18] sm:$0xff] %vm290_vm0, %v1372_v60  ;;  %578 = vperm.xlu1 %1140, %v1372_v60   ;;  %v623_v57 = vld [vmem:[#allocation4 + $0x8] sm:$0xff] }
 0x19d   : > { %v1381_v0 = vpop.eup %1141  ;;  %v559_v35 = vmul.f32 1.442695, %v552_v61 }
 0x19e   : > { %v597_v39 = vmul.f32 %v1381_v0, %v593_v38 }
 0x19f   : > { %628 = vperm.xlu1 %1140, %v1381_v0  }
 0x20e   : > { %v564_v3 = vpop.permute.xlu0 %563 }
 0x20f   : > { %v581_v5 = vsub.f32 %v1338_v22, %v564_v3 }
 0x211   : > { %v585_v6 = vmul.f32 1.442695, %v581_v5 }
 0x212   : > { %v569_v7 = vpop.permute.xlu1 %568 }
 0x213   : > { %1143 = vpow2.f32 %v585_v6  ;;  %v582_v8 = vsub.f32 %v1342_v24, %v569_v7 }
 0x215   : > { %v587_v9 = vmul.f32 1.442695, %v582_v8 }
 0x216   : > { %v574_v10 = vpop.permute.xlu1 %573 }
 0x217   : > { %1145 = vpow2.f32 %v587_v9  ;;  %v583_v11 = vsub.f32 %v527_v34, %v574_v10  ;;  %v625_v9 = vld [vmem:[#allocation4 + $0x18] sm:$0xff] }
 0x219   : > { %v589_v12 = vmul.f32 1.442695, %v583_v11 }
 0x21a   : > { %v579_v13 = vpop.permute.xlu1 %578 }
 0x21b   : > { %1147 = vpow2.f32 %v589_v12  ;;  %v584_v14 = vsub.f32 %v1352_v36, %v579_v13 }
 0x21d   : > { %v1144_v16 = vpop.eup %1143  ;;  %v591_v17 = vmul.f32 1.442695, %v584_v14 }
 0x21e   : > { %v601_v18 = vsel %vm299_vm1, %v1144_v16, 0.0  ;;  %v650_v19 = vpack.c.bf16 %v1144_v16, %v1144_v16  ;;  %v629_v37 = vpop.permute.xlu1 %628 }
 0x21f   : > { %1149 = vpow2.f32 %v591_v17  ;;  %602 = vadd.xlane.f32.xlu1 %v601_v18  ;;  %v646_v56 = vmul.f32 %v629_v37, %v622_v55 }
 0x220   : > { %1087 = vmatmul.mubr.msk.bf16.vlgmr.msra.gmra.mrb[8].mxu0 %vm299_vm1, %v650_v19  ;;  %1151 = vpow2.f32 %v557_v23 }
 0x221   : > { %v1146_v22 = vpop.eup %1145  ;;  %1097 = vmatpush3.bf16.msra.mxu0 %v751_v20  ;;  %1098 = vmatprep.mubr.msk.bf16.mxu0 %vm1209_vm2, %v1208_v4  ;;  %1153 = vpow2.f32 %v555_v30 }
 0x222   : > { %v604_v24 = vsel %vm299_vm1, %v1146_v22, 0.0  ;;  %v651_v25 = vpack.c.bf16 %v1146_v22, %v1146_v22  ;;  %1155 = vpow2.f32 %v559_v35 }
 0x223   : > { %605 = vadd.xlane.f32.xlu0 %v604_v24 }
 0x224   : > { %1093 = vmatmul.mubr.msk.bf16.vlgmr.msra.gmra.mrb[8].mxu1 %vm299_vm1, %v651_v25 }
 0x225   : > { %v1148_v27 = vpop.eup %1147  ;;  %1103 = vmatpush3.bf16.msra.mxu1 %v797_v26  ;;  %1104 = vmatprep.mubr.msk.bf16.mxu1 %vm1209_vm2, %v1208_v4 }
 0x226   : > { %v652_v28 = vpack.c.bf16 %v1148_v27, %v1148_v27  ;;  %v607_v34 = vsel %vm299_vm1, %v1148_v27, 0.0 }
 0x228   : > { %1099 = vmatmul.mubr.msk.bf16.vlgmr.msra.gmra.mrb[12].mxu0 %vm299_vm1, %v652_v28 }
 0x229   : > { %v1150_v29 = vpop.eup %1149 }
 0x22a   : > { %v653_v31 = vpack.c.bf16 %v1150_v29, %v1150_v29  ;;  %v1152_v32 = vpop.eup %1151  ;;  %v610_v4 = vsel %vm299_vm1, %v1150_v29, 0.0 }
 0x22b   : > { %v1154_v33 = vpop.eup %1153  ;;  %v599_v48 = vmul.f32 %v1152_v32, %v595_v47 }
 0x22c   : > { %1105 = vmatmul.mubr.msk.bf16.vlgmr.msra.gmra.mrb[12].mxu1 %vm299_vm1, %v653_v31  ;;  %v1156_v36 = vpop.eup %1155  ;;  %v598_v43 = vmul.f32 %v1154_v33, %v594_v41 }
 0x22d   : > { %v600_v52 = vmul.f32 %v1156_v36, %v596_v50 }
 0x230   : > { %638 = vperm.xlu1 %1140, %v1152_v32  }
 0x239   : > { %633 = vperm.xlu0 %1139, %v1154_v33  }
 0x254   : > { %608 = vadd.xlane.f32.xlu1 %v607_v34 }
 0x258   : > { %611 = vadd.xlane.f32.xlu1 %v610_v4 }
 0x269   : > { %643 = vperm.xlu1 %1140, %v1156_v36  }
 0x2ac   : > { %v603_v40 = vpop.xlane.xlu1 %602 }
 0x2ad   : > { %v613_v42 = vadd.f32 %v603_v40, %v597_v39 }
 0x2af   : > { %618 = vst.msk [vmem:[#allocation3] sm:$0xff] %vm290_vm0, %v613_v42 }
 0x2b0   : > { %v606_v44 = vpop.xlane.xlu0 %605  ;;  %v639_v46 = vpop.permute.xlu1 %638 }
 0x2b1   : > { %v614_v45 = vadd.f32 %v606_v44, %v598_v43  ;;  %v648_v7 = vmul.f32 %v639_v46, %v624_v1 }
 0x2b3   : > { %619 = vst.msk [vmem:[#allocation3 + $0x8] sm:$0xff] %vm290_vm0, %v614_v45 }
 0x2b8   : > { %v634_v58 = vpop.permute.xlu0 %633 }
 0x2b9   : > { %v647_v63 = vmul.f32 %v634_v58, %v623_v57 }
 0x2e1   : > { %v609_v49 = vpop.xlane.xlu1 %608 }
 0x2e2   : > { %v615_v51 = vadd.f32 %v609_v49, %v599_v48 }
 0x2e4   : > { %620 = vst.msk [vmem:[#allocation3 + $0x10] sm:$0xff] %vm290_vm0, %v615_v51 }
 0x2e5   : > { %v612_v53 = vpop.xlane.xlu1 %611 }
 0x2e6   : > { %v616_v54 = vadd.f32 %v612_v53, %v600_v52 }
 0x2e8   : > { %621 = vst.msk [vmem:[#allocation3 + $0x18] sm:$0xff] %vm290_vm0, %v616_v54 }
 0x2e9   : > { %v644_v10 = vpop.permute.xlu1 %643 }
 0x2ea   : > { %v649_v15 = vmul.f32 %v644_v10, %v625_v9 }
 0x2f3   : > { %v695_v59 = vpop.f32.mrb[8].mxu0 }
 0x2f4   : > { %v839_v60 = vadd.f32 %v695_v59, %v646_v56  ;;  %v1088_v61 = vpop.f32.mrb[9].mxu0 }
 0x2f5   : > { %v698_v62 = vpop.f32.mrb[10].mxu0 }
 0x2f6   : > { %843 = vst.msk [vmem:[#allocation4] sm:$0xff] %vm299_vm1, %v839_v60  ;;  %v1089_v0 = vpop.f32.mrb[11].mxu0 }
 0x2f7   : > { %v741_v2 = vpop.f32.mrb[8].mxu1 }
 0x2f8   : > { %v840_v3 = vadd.f32 %v741_v2, %v647_v63  ;;  %v1094_v5 = vpop.f32.mrb[9].mxu1 }
 0x2f9   : > { %v744_v6 = vpop.f32.mrb[10].mxu1 }
 0x2fa   : > { %844 = vst.msk [vmem:[#allocation4 + $0x8] sm:$0xff] %vm299_vm1, %v840_v3  ;;  %v1095_v8 = vpop.f32.mrb[11].mxu1 }
 0x2fb   : > { %v787_v11 = vpop.f32.mrb[12].mxu0 }
 0x2fc   : > { %v841_v12 = vadd.f32 %v787_v11, %v648_v7  ;;  %v1100_v13 = vpop.f32.mrb[13].mxu0 }
 0x2fd   : > { %v790_v14 = vpop.f32.mrb[14].mxu0 }
 0x2fe   : > { %845 = vst.msk [vmem:[#allocation4 + $0x10] sm:$0xff] %vm299_vm1, %v841_v12  ;;  %v1101_v16 = vpop.f32.mrb[15].mxu0 }
 0x2ff   : > { %v833_v17 = vpop.f32.mrb[12].mxu1 }
 0x300   : > { %v842_v18 = vadd.f32 %v833_v17, %v649_v15  ;;  %v1106_v19 = vpop.f32.mrb[13].mxu1 }
 0x301   : > { %v836_v20 = vpop.f32.mrb[14].mxu1 }
 0x302   : > { %846 = vst.msk [vmem:[#allocation4 + $0x18] sm:$0xff] %vm299_vm1, %v842_v18  ;;  %v1107_v21 = vpop.f32.mrb[15].mxu1 }
 0x303 PF: > { %v856_v22 = vld [vmem:[#allocation3 + $0x10] sm:$0xff]  ;;  %v854_v23 = vld [vmem:[#allocation3] sm:$0xff]  ;;  %v857_v24 = vld [vmem:[#allocation3 + $0x18] sm:$0xff]  ;;  %v1211_v25 = vmov 0   ;;  %vm902_vm11 = vcmask 60416  }
 0x304   : > { %1158 = vset.pattern.permute.xlu1 %v1211_v25  ;;  %1157 = vset.pattern.permute.xlu0 %v1211_v25  ;;  %vm860_vm7 = vcmp.gt.f32.partialorder %v856_v22, 0.0  ;;  %vm858_vm8 = vcmp.gt.f32.partialorder %v854_v23, 0.0  ;;  %vm861_vm9 = vcmp.gt.f32.partialorder %v857_v24, 0.0  ;;  %v855_v26 = vld [vmem:[#allocation3 + $0x8] sm:$0xff]  ;;  %v866_v4 = vld [vmem:[#allocation4] sm:$0xff] }
 0x305   : > { %v864_v27 = vsel %vm860_vm7, %v856_v22, 1.0  ;;  %v862_v28 = vsel %vm858_vm8, %v854_v23, 1.0  ;;  %v865_v29 = vsel %vm861_vm9, %v857_v24, 1.0  ;;  %vm859_vm10 = vcmp.gt.f32.partialorder %v855_v26, 0.0  ;;  %v868_v37 = vld [vmem:[#allocation4 + $0x10] sm:$0xff]  ;;  %v867_v40 = vld [vmem:[#allocation4 + $0x8] sm:$0xff] }
 0x306   : > { %1159 = vrcp.f32 %v864_v27  ;;  %v863_v30 = vsel %vm859_vm10, %v855_v26, 1.0 }
 0x307   : > { %1161 = vrcp.f32 %v862_v28 }
 0x308   : > { %1163 = vrcp.f32 %v865_v29 }
 0x309   : > { %1165 = vrcp.f32 %v863_v30  ;;  %v869_v39 = vld [vmem:[#allocation4 + $0x18] sm:$0xff] }
 0x310   : > { %v1160_v31 = vpop.eup %1159 }
 0x311   : > { %v1162_v32 = vpop.eup %1161  ;;  %886 = vperm.xlu1 %1158, %v1160_v31  }
 0x312   : > { %v1164_v33 = vpop.eup %1163  ;;  %876 = vperm.xlu0 %1157, %v1162_v32  }
 0x313   : > { %v1166_v34 = vpop.eup %1165 }
 0x315   : > { %891 = vperm.xlu1 %1158, %v1164_v33  }
 0x316   : > { %881 = vperm.xlu0 %1157, %v1166_v34  }
 0x390   : > { %v887_v35 = vpop.permute.xlu1 %886 }
 0x391   : > { %v877_v36 = vpop.permute.xlu0 %876  ;;  %v896_v43 = vmul.f32 %v887_v35, %v868_v37 }
 0x392   : > { %v894_v38 = vmul.f32 %v877_v36, %v866_v4 }
 0x393   : > { %v900_v48 = vpack.c.bf16 %v896_v43, %v896_v43 }
 0x394   : > { %v898_v41 = vpack.c.bf16 %v894_v38, %v894_v38  ;;  %v892_v42 = vpop.permute.xlu1 %891 }
 0x395   : > { %v882_v44 = vpop.permute.xlu0 %881  ;;  %v897_v45 = vmul.f32 %v892_v42, %v869_v39  ;;  %905 = vst.msk [vmem:[%s1298_s12 + $0x8] sm:$0xf] %vm902_vm11, %v900_v48 }
 0x396   : > { %903 = vst.msk [vmem:[%s1298_s12] sm:$0xf] %vm902_vm11, %v898_v41  ;;  %v895_v46 = vmul.f32 %v882_v44, %v867_v40 }
 0x397   : > { %v901_v49 = vpack.c.bf16 %v897_v45, %v897_v45 }
 0x398   : > { %v899_v47 = vpack.c.bf16 %v895_v46, %v895_v46 }
 0x399   : > { %906 = vst.msk [vmem:[%s1298_s12 + $0xc] sm:$0xf] %vm902_vm11, %v901_v49 }
 0x39a   : > { %904 = vst.msk [vmem:[%s1298_s12 + $0x4] sm:$0xf] %vm902_vm11, %v899_v47 }
 0x39b PF: > { %s20_s22 = sadd.s32 1, %s1203_s22   ;;  %s1443_s20 = smov %s1199_s21 }
 0x39c   : > { %p17_p11 = scmp.ge.s32.totalorder %s20_s22, 4   ;;  %s1444_s21 = smov %s1446_s0 }
 0x39e   :  { %19 = sbr.rel (!%p17_p11) target bundleno = 17 (0x11), region = 80 }

// kernel: transformer_forward.14
= control target key start
LH: loop header
LB: loop body
LE: loop exit
PB: predicated region body
PF: predicated region fallthrough
CT: control target
= control target key end

     0   :  { %s1424_s0 = inlined_call_operand.vmem [shape: s32[2], index: 0, kind: input, shape index: {}]   ;;  %s1425_s1 = inlined_call_operand.vmem [shape: bf16[8,8,8], index: 1, kind: input, shape index: {}]   ;;  %s1426_s2 = inlined_call_operand.vmem [shape: bf16[8,8,8], index: 2, kind: input, shape index: {}]   ;;  %s1427_s3 = inlined_call_operand.vmem [shape: bf16[8,8,8], index: 3, kind: input, shape index: {}]   ;;  %s1428_s4 = inlined_call_operand.vmem [shape: bf16[8,8,8], index: 4, kind: output, shape index: {}]  }
   0x1   :  { %s9_s17 = sshll.u32 %s1424_s0, 4  ;;  %s10_s17 = int_to_ptr.vmem [resolvable:$true] %s9_s17 }
   0x2   :  { %s1156_s18 = scalar_lea.vmem %s10_s17, 16  ;;  %p1161_p1 = scmp.lt.s32.totalorder %s10_s17, %s10_s17 }
   0x3   :  { %p1157_p0 = scmp.ne.s32.totalorder %s10_s17, %s1156_s18  ;;  %p1162_p2 = scmp.lt.s32.totalorder %s1156_s18, %s1156_s18 }
   0x5   :  { %p1163_p3 = por %p1162_p2, %p1161_p1 }
   0x7   :  { %p1164_p4 = pnand %p1163_p3, %p1157_p0 }
   0x9   :  { %1167 = shalt.err (!%p1164_p4)  }
   0xa   :  { %s1194_s19 = smov [#allocation6]  }
   0xb   :  { %12 = dma.vmem_to_smem %s10_s17, 16, %s1194_s19, [#allocation5] }
   0xc   :  { %1180 = dma.done.wait [#allocation5], 16 }
   0xd   :  { %1181 = vsyncadd [#allocation5], 4294967280 }
   0xe   :  { %14 = sfence }
   0xf   :  { %s1229_s20 = smov 0   ;;  %s1231_s21 = smov 0  }
  0x10   :  { %s1233_s22 = smov 0  }
  0x11 LB: > { %s39_s0 = sadd.s32 1, %s1188_s21  ;;  %p1012_p5 = scmp.ge.s32.totalorder %s1192_s22, 1  ;;  %s1192_s22 = sphi %s1233_s22, %s20_s22   ;;  %s1188_s21 = sphi %s1231_s21, %s1433_s21   ;;  %s1184_s20 = sphi %s1229_s20, %s1432_s20  }
  0x12   : > { %p41_p6 = scmp.ge.s32.totalorder %s39_s0, 2  ;;  %p203_p7 = scmp.lt.s32.totalorder %s1192_s22, 3 }
  0x14   : > { %s1435_s0 = smov (%p41_p6, %s39_s0), 0  ;;  %p204_p8 = pnand %p1012_p5, %p203_p7 }
  0x15   : > { %s1013_s23 = sshll.u32 (!%p204_p8), %s1184_s20, 2  ;;  %vm290_vm0 = vcmask (!%p204_p8), 7168   ;;  %s1251_s24 = sld [smem:[#allocation6 + %s1184_s20]] (!%p204_p8)  ;;  %v1195_v0 = vmov (!%p204_p8), -1e+30   ;;  %v1196_v1 = vmov (!%p204_p8), 0.0  }
  0x16   : > { %207 = sbr.rel (%p204_p8) target bundleno = 923 (0x39b), region = 32  ;;  %p1253_p9 = scmp.lt.s32.totalorder (!%p204_p8), %s1013_s23, 7  ;;  %291 = vst.msk [vmem:[#allocation2] sm:$0xff] (!%p204_p8), %vm290_vm0, %v1195_v0  ;;  %292 = vst.msk [vmem:[#allocation2 + $0x8] sm:$0xff] (!%p204_p8), %vm290_vm0, %v1195_v0  ;;  %vm299_vm1 = vcmask (!%p204_p8), 64512  }
  0x17   : > { %293 = vst.msk [vmem:[#allocation2 + $0x10] sm:$0xff] (!%p204_p8), %vm290_vm0, %v1195_v0  ;;  %294 = vst.msk [vmem:[#allocation2 + $0x18] sm:$0xff] (!%p204_p8), %vm290_vm0, %v1195_v0 }
  0x18   : > { %295 = vst.msk [vmem:[#allocation3] sm:$0xff] (!%p204_p8), %vm290_vm0, %v1196_v1  ;;  %296 = vst.msk [vmem:[#allocation3 + $0x8] sm:$0xff] (!%p204_p8), %vm290_vm0, %v1196_v1 }
  0x19   : > { %297 = vst.msk [vmem:[#allocation3 + $0x10] sm:$0xff] (!%p204_p8), %vm290_vm0, %v1196_v1  ;;  %298 = vst.msk [vmem:[#allocation3 + $0x18] sm:$0xff] (!%p204_p8), %vm290_vm0, %v1196_v1 }
  0x1a   : > { %300 = vst.msk [vmem:[#allocation4] sm:$0xff] (!%p204_p8), %vm299_vm1, %v1196_v1  ;;  %301 = vst.msk [vmem:[#allocation4 + $0x8] sm:$0xff] (!%p204_p8), %vm299_vm1, %v1196_v1 }
  0x1b   : > { %302 = vst.msk [vmem:[#allocation4 + $0x10] sm:$0xff] (!%p204_p8), %vm299_vm1, %v1196_v1  ;;  %303 = vst.msk [vmem:[#allocation4 + $0x18] sm:$0xff] (!%p204_p8), %vm299_vm1, %v1196_v1  ;;  %p1022_p10 = scmp.le.s32.totalorder (!%p204_p8), %s1251_s24, 0 }
  0x1d   : > { %s1437_s23 = smov (!%p1253_p9, %s1013_s23), 7  ;;  %309 = sbr.rel (%p1022_p10) target bundleno = 771 (0x303), region = 40 }
  0x1e   : > { %s1014_s26 = sshll.u32 %s1437_s23, 2  ;;  %v1197_v4 = vmov (!%p1022_p10), 0.0   ;;  %vm1198_vm2 = vmmov (!%p1022_p10), 0   ;;  %v507_v15 = vlaneseq (!%p1022_p10)  ;;  %v511_v17 = vstv (!%p1022_p10), %s1251_s24  ;;  %v519_v44 = vld [vmem:[#allocation2] sm:$0xff] (!%p1022_p10)  ;;  %v1346_v47 = vld [vmem:[#allocation2 + $0x8] sm:$0xff] (!%p1022_p10)  ;;  %v521_v52 = vld [vmem:[#allocation2 + $0x10] sm:$0xff] (!%p1022_p10) }
  0x1f   : > { %s1274_s29 = scalar_lea.vmem %s1425_s1, %s1014_s26  ;;  %s265_s6 = scalar_lea.vmem %s1426_s2, %s1014_s26  ;;  %1049 = vmatprep.subr.bf16.mxu0 (!%p1022_p10), %v1197_v4  ;;  %1055 = vmatprep.subr.bf16.mxu1 (!%p1022_p10), %v1197_v4  ;;  %v1199_v43 = vmov (!%p1022_p10), 0   ;;  %v1357_v56 = vld [vmem:[#allocation2 + $0x18] sm:$0xff] (!%p1022_p10)  ;;  %vm647_vm4 = vcmask (!%p1022_p10), 1043456  }
  0x20   : > { %s1282_s9 = scalar_lea.vmem %s1427_s3, %s1014_s26  ;;  %s1287_s12 = scalar_lea.vmem %s1428_s4, %s1014_s26  ;;  %v314_v2 = vld [vmem:[%s265_s6] sm:$0xf] (!%p1022_p10)  ;;  %v315_v3 = vld [vmem:[%s265_s6 + $0x4] sm:$0xf] (!%p1022_p10)  ;;  %1051 = vmatprep.mubr.msk.bf16.mxu0 (!%p1022_p10), %vm1198_vm2, %v1197_v4  ;;  %1057 = vmatprep.mubr.msk.bf16.mxu1 (!%p1022_p10), %vm1198_vm2, %v1197_v4  ;;  %v316_v7 = vld [vmem:[%s265_s6 + $0x8] sm:$0xf] (!%p1022_p10) }
  0x21   : > { %v327_v5 = vsel (!%p1022_p10), %vm299_vm1, %v314_v2, 0  ;;  %v373_v6 = vsel (!%p1022_p10), %vm299_vm1, %v315_v3, 0  ;;  %v317_v8 = vld [vmem:[%s265_s6 + $0xc] sm:$0xf] (!%p1022_p10)  ;;  %v310_v9 = vld [vmem:[%s1274_s29] sm:$0xf] (!%p1022_p10)  ;;  %1128 = vset.pattern.permute.xlu0 (!%p1022_p10), %v1199_v43  ;;  %1129 = vset.pattern.permute.xlu1 (!%p1022_p10), %v1199_v43 }
  0x22   : > { %1050 = vmatpush3.bf16.xpose.msra.mxu0 (!%p1022_p10), %v327_v5  ;;  %1056 = vmatpush3.bf16.xpose.msra.mxu1 (!%p1022_p10), %v373_v6  ;;  %v311_v10 = vld [vmem:[%s1274_s29 + $0x4] sm:$0xf] (!%p1022_p10)  ;;  %v419_v11 = vsel (!%p1022_p10), %vm299_vm1, %v316_v7, 0  ;;  %v465_v12 = vsel (!%p1022_p10), %vm299_vm1, %v317_v8, 0  ;;  %v312_v13 = vld [vmem:[%s1274_s29 + $0x8] sm:$0xf] (!%p1022_p10) }
  0x23   : > { %1061 = vmatprep.subr.bf16.mxu0 (!%p1022_p10), %v1197_v4  ;;  %1067 = vmatprep.subr.bf16.mxu1 (!%p1022_p10), %v1197_v4  ;;  %v313_v14 = vld [vmem:[%s1274_s29 + $0xc] sm:$0xf] (!%p1022_p10)  ;;  %v508_v16 = vand.u32 (!%p1022_p10), 127, %v507_v15  ;;  %v318_v61 = vld [vmem:[%s1282_s9] sm:$0xf] (!%p1022_p10) }
  0x24   : > { %v649_v62 = vsel %vm647_vm4, %v318_v61, 0  ;;  %v319_v0 = vld [vmem:[%s1282_s9 + $0x4] sm:$0xf] }
  0x25   : > { %vm1321_vm3 = vcmp.lt.s32.totalorder %v508_v16, %v511_v17  ;;  %v695_v1 = vsel %vm647_vm4, %v319_v0, 0  ;;  %v614_v0 = vld [vmem:[#allocation4 + $0x10] sm:$0xff] }
  0x29   : > { %1052 = vmatmul.mubr.msk.bf16.vlgmr.msra.gmra.mrb[0].mxu0 %vm299_vm1, %v310_v9  ;;  %1058 = vmatmul.mubr.msk.bf16.vlgmr.msra.gmra.mrb[0].mxu1 %vm299_vm1, %v311_v10 }
  0x2a   : > { %1062 = vmatpush3.bf16.xpose.msra.mxu0 %v419_v11  ;;  %1068 = vmatpush3.bf16.xpose.msra.mxu1 %v465_v12 }
  0x2b   : > { %1063 = vmatprep.mubr.msk.bf16.mxu0 %vm1198_vm2, %v1197_v4  ;;  %1069 = vmatprep.mubr.msk.bf16.mxu1 %vm1198_vm2, %v1197_v4 }
  0x2c   : > { %1073 = vmatprep.subr.bf16.mxu0 %v1197_v4  ;;  %1079 = vmatprep.subr.bf16.mxu1 %v1197_v4 }
  0x31   : > { %1064 = vmatmul.mubr.msk.bf16.vlgmr.msra.gmra.mrb[4].mxu0 %vm299_vm1, %v312_v13  ;;  %1070 = vmatmul.mubr.msk.bf16.vlgmr.msra.gmra.mrb[4].mxu1 %vm299_vm1, %v313_v14  ;;  %v320_v14 = vld [vmem:[%s1282_s9 + $0x8] sm:$0xf] }
  0x32   : > { %1075 = vmatprep.mubr.msk.bf16.mxu0 %vm1198_vm2, %v1197_v4  ;;  %1081 = vmatprep.mubr.msk.bf16.mxu1 %vm1198_vm2, %v1197_v4 }
  0x33   : > { %1074 = vmatpush3.bf16.msra.mxu0 %v649_v62  ;;  %1080 = vmatpush3.bf16.msra.mxu1 %v695_v1 }
  0x34   : > { %1085 = vmatprep.subr.bf16.mxu0 %v1197_v4  ;;  %1091 = vmatprep.subr.bf16.mxu1 %v1197_v4 }
  0xfc   : > { %v363_v19 = vpop.f32.mrb[0].mxu0  ;;  %v409_v20 = vpop.f32.mrb[0].mxu1 }
  0xfd   : > { %v1327_v21 = vsel %vm1321_vm3, %v363_v19, -1e+30  ;;  %v1053_v22 = vpop.f32.mrb[1].mxu0  ;;  %v1331_v23 = vsel %vm1321_vm3, %v409_v20, -1e+30  ;;  %v1059_v24 = vpop.f32.mrb[1].mxu1 }
  0xfe   : > { %v366_v25 = vpop.f32.mrb[2].mxu0  ;;  %v523_v26 = vsel %vm299_vm1, %v1327_v21, -inf  ;;  %v412_v27 = vpop.f32.mrb[2].mxu1  ;;  %v526_v30 = vsel %vm299_vm1, %v1331_v23, -inf  ;;  %v741_v19 = vsel %vm647_vm4, %v320_v14, 0 }
  0xff   : > { %524 = vmax.xlane.f32.xlu0 %v523_v26  ;;  %v1054_v28 = vpop.f32.mrb[3].mxu0  ;;  %v1060_v29 = vpop.f32.mrb[3].mxu1  ;;  %v321_v20 = vld [vmem:[%s1282_s9 + $0xc] sm:$0xf] }
 0x100   : > { %v787_v25 = vsel %vm647_vm4, %v321_v20, 0 }
 0x103   : > { %527 = vmax.xlane.f32.xlu0 %v526_v30 }
 0x104   : > { %v455_v31 = vpop.f32.mrb[4].mxu0  ;;  %v501_v32 = vpop.f32.mrb[4].mxu1 }
 0x105   : > { %v517_v33 = vsel %vm1321_vm3, %v455_v31, -1e+30  ;;  %v1065_v34 = vpop.f32.mrb[5].mxu0  ;;  %v1341_v35 = vsel %vm1321_vm3, %v501_v32, -1e+30  ;;  %v1071_v36 = vpop.f32.mrb[5].mxu1 }
 0x106   : > { %v458_v37 = vpop.f32.mrb[6].mxu0  ;;  %v529_v38 = vsel %vm299_vm1, %v517_v33, -inf  ;;  %v504_v39 = vpop.f32.mrb[6].mxu1  ;;  %v532_v42 = vsel %vm299_vm1, %v1341_v35, -inf }
 0x107   : > { %530 = vmax.xlane.f32.xlu1 %v529_v38  ;;  %v1066_v40 = vpop.f32.mrb[7].mxu0  ;;  %v1072_v41 = vpop.f32.mrb[7].mxu1  ;;  %v583_v37 = vld [vmem:[#allocation3] sm:$0xff] }
 0x108   : > { %v584_v40 = vld [vmem:[#allocation3 + $0x8] sm:$0xff] }
 0x10b   : > { %533 = vmax.xlane.f32.xlu1 %v532_v42 }
 0x18c   : > { %v525_v45 = vpop.xlane.xlu0 %524 }
 0x18d   : > { %v535_v46 = vmax.f32 %v519_v44, %v525_v45 }
 0x18f   : > { %v539_v48 = vsub.f32 %v519_v44, %v535_v46  ;;  %837 = vst.msk [vmem:[#allocation2] sm:$0xff] %vm290_vm0, %v535_v46  ;;  %553 = vperm.xlu0 %1128, %v535_v46   ;;  %v585_v46 = vld [vmem:[#allocation3 + $0x10] sm:$0xff] }
 0x190   : > { %v528_v49 = vpop.xlane.xlu0 %527 }
 0x191   : > { %v543_v50 = vmul.f32 1.442695, %v539_v48  ;;  %v1350_v51 = vmax.f32 %v1346_v47, %v528_v49  ;;  %v586_v49 = vld [vmem:[#allocation3 + $0x18] sm:$0xff] }
 0x193   : > { %1130 = vpow2.f32 %v543_v50  ;;  %v540_v53 = vsub.f32 %v1346_v47, %v1350_v51  ;;  %838 = vst.msk [vmem:[#allocation2 + $0x8] sm:$0xff] %vm290_vm0, %v1350_v51  ;;  %558 = vperm.xlu1 %1129, %v1350_v51  }
 0x194   : > { %v531_v54 = vpop.xlane.xlu1 %530 }
 0x195   : > { %v537_v55 = vmax.f32 %v521_v52, %v531_v54  ;;  %v545_v29 = vmul.f32 1.442695, %v540_v53  ;;  %v612_v54 = vld [vmem:[#allocation4] sm:$0xff] }
 0x197   : > { %v541_v57 = vsub.f32 %v521_v52, %v537_v55  ;;  %839 = vst.msk [vmem:[#allocation2 + $0x10] sm:$0xff] %vm290_vm0, %v537_v55  ;;  %563 = vperm.xlu1 %1129, %v537_v55  }
 0x198   : > { %v534_v58 = vpop.xlane.xlu1 %533 }
 0x199   : > { %v1361_v59 = vmax.f32 %v1357_v56, %v534_v58  ;;  %v547_v22 = vmul.f32 1.442695, %v541_v57 }
 0x19b   : > { %v542_v60 = vsub.f32 %v1357_v56, %v1361_v59  ;;  %840 = vst.msk [vmem:[#allocation2 + $0x18] sm:$0xff] %vm290_vm0, %v1361_v59  ;;  %568 = vperm.xlu1 %1129, %v1361_v59   ;;  %v613_v56 = vld [vmem:[#allocation4 + $0x8] sm:$0xff] }
 0x19d   : > { %v1370_v63 = vpop.eup %1130  ;;  %v549_v34 = vmul.f32 1.442695, %v542_v60 }
 0x19e   : > { %v587_v38 = vmul.f32 %v1370_v63, %v583_v37 }
 0x19f   : > { %618 = vperm.xlu1 %1129, %v1370_v63  }
 0x20e   : > { %v554_v2 = vpop.permute.xlu0 %553 }
 0x20f   : > { %v571_v3 = vsub.f32 %v1327_v21, %v554_v2 }
 0x211   : > { %v575_v5 = vmul.f32 1.442695, %v571_v3 }
 0x212   : > { %v559_v6 = vpop.permute.xlu1 %558 }
 0x213   : > { %1132 = vpow2.f32 %v575_v5  ;;  %v572_v7 = vsub.f32 %v1331_v23, %v559_v6 }
 0x215   : > { %v577_v8 = vmul.f32 1.442695, %v572_v7 }
 0x216   : > { %v564_v9 = vpop.permute.xlu1 %563 }
 0x217   : > { %1134 = vpow2.f32 %v577_v8  ;;  %v573_v10 = vsub.f32 %v517_v33, %v564_v9  ;;  %v615_v8 = vld [vmem:[#allocation4 + $0x18] sm:$0xff] }
 0x219   : > { %v579_v11 = vmul.f32 1.442695, %v573_v10 }
 0x21a   : > { %v569_v12 = vpop.permute.xlu1 %568 }
 0x21b   : > { %1136 = vpow2.f32 %v579_v11  ;;  %v574_v13 = vsub.f32 %v1341_v35, %v569_v12 }
 0x21d   : > { %v1133_v15 = vpop.eup %1132  ;;  %v581_v16 = vmul.f32 1.442695, %v574_v13 }
 0x21e   : > { %v591_v17 = vsel %vm299_vm1, %v1133_v15, 0.0  ;;  %v640_v18 = vpack.c.bf16 %v1133_v15, %v1133_v15  ;;  %v619_v36 = vpop.permute.xlu1 %618 }
 0x21f   : > { %1138 = vpow2.f32 %v581_v16  ;;  %592 = vadd.xlane.f32.xlu1 %v591_v17  ;;  %v636_v55 = vmul.f32 %v619_v36, %v612_v54 }
 0x220   : > { %1076 = vmatmul.mubr.msk.bf16.vlgmr.msra.gmra.mrb[8].mxu0 %vm299_vm1, %v640_v18  ;;  %1140 = vpow2.f32 %v547_v22 }
 0x221   : > { %v1135_v21 = vpop.eup %1134  ;;  %1086 = vmatpush3.bf16.msra.mxu0 %v741_v19  ;;  %1087 = vmatprep.mubr.msk.bf16.mxu0 %vm1198_vm2, %v1197_v4  ;;  %1142 = vpow2.f32 %v545_v29 }
 0x222   : > { %v594_v23 = vsel %vm299_vm1, %v1135_v21, 0.0  ;;  %v641_v24 = vpack.c.bf16 %v1135_v21, %v1135_v21  ;;  %1144 = vpow2.f32 %v549_v34 }
 0x223   : > { %595 = vadd.xlane.f32.xlu0 %v594_v23 }
 0x224   : > { %1082 = vmatmul.mubr.msk.bf16.vlgmr.msra.gmra.mrb[8].mxu1 %vm299_vm1, %v641_v24 }
 0x225   : > { %v1137_v26 = vpop.eup %1136  ;;  %1092 = vmatpush3.bf16.msra.mxu1 %v787_v25  ;;  %1093 = vmatprep.mubr.msk.bf16.mxu1 %vm1198_vm2, %v1197_v4 }
 0x226   : > { %v642_v27 = vpack.c.bf16 %v1137_v26, %v1137_v26  ;;  %v597_v33 = vsel %vm299_vm1, %v1137_v26, 0.0 }
 0x228   : > { %1088 = vmatmul.mubr.msk.bf16.vlgmr.msra.gmra.mrb[12].mxu0 %vm299_vm1, %v642_v27 }
 0x229   : > { %v1139_v28 = vpop.eup %1138 }
 0x22a   : > { %v643_v30 = vpack.c.bf16 %v1139_v28, %v1139_v28  ;;  %v1141_v31 = vpop.eup %1140  ;;  %v600_v4 = vsel %vm299_vm1, %v1139_v28, 0.0 }
 0x22b   : > { %v1143_v32 = vpop.eup %1142  ;;  %v589_v47 = vmul.f32 %v1141_v31, %v585_v46 }
 0x22c   : > { %1094 = vmatmul.mubr.msk.bf16.vlgmr.msra.gmra.mrb[12].mxu1 %vm299_vm1, %v643_v30  ;;  %v1145_v35 = vpop.eup %1144  ;;  %v588_v42 = vmul.f32 %v1143_v32, %v584_v40 }
 0x22d   : > { %v590_v51 = vmul.f32 %v1145_v35, %v586_v49 }
 0x230   : > { %628 = vperm.xlu1 %1129, %v1141_v31  }
 0x239   : > { %623 = vperm.xlu0 %1128, %v1143_v32  }
 0x254   : > { %598 = vadd.xlane.f32.xlu1 %v597_v33 }
 0x258   : > { %601 = vadd.xlane.f32.xlu1 %v600_v4 }
 0x269   : > { %633 = vperm.xlu1 %1129, %v1145_v35  }
 0x2ac   : > { %v593_v39 = vpop.xlane.xlu1 %592 }
 0x2ad   : > { %v603_v41 = vadd.f32 %v593_v39, %v587_v38 }
 0x2af   : > { %608 = vst.msk [vmem:[#allocation3] sm:$0xff] %vm290_vm0, %v603_v41 }
 0x2b0   : > { %v596_v43 = vpop.xlane.xlu0 %595  ;;  %v629_v45 = vpop.permute.xlu1 %628 }
 0x2b1   : > { %v604_v44 = vadd.f32 %v596_v43, %v588_v42  ;;  %v638_v6 = vmul.f32 %v629_v45, %v614_v0 }
 0x2b3   : > { %609 = vst.msk [vmem:[#allocation3 + $0x8] sm:$0xff] %vm290_vm0, %v604_v44 }
 0x2b8   : > { %v624_v57 = vpop.permute.xlu0 %623 }
 0x2b9   : > { %v637_v62 = vmul.f32 %v624_v57, %v613_v56 }
 0x2e1   : > { %v599_v48 = vpop.xlane.xlu1 %598 }
 0x2e2   : > { %v605_v50 = vadd.f32 %v599_v48, %v589_v47 }
 0x2e4   : > { %610 = vst.msk [vmem:[#allocation3 + $0x10] sm:$0xff] %vm290_vm0, %v605_v50 }
 0x2e5   : > { %v602_v52 = vpop.xlane.xlu1 %601 }
 0x2e6   : > { %v606_v53 = vadd.f32 %v602_v52, %v590_v51 }
 0x2e8   : > { %611 = vst.msk [vmem:[#allocation3 + $0x18] sm:$0xff] %vm290_vm0, %v606_v53 }
 0x2e9   : > { %v634_v9 = vpop.permute.xlu1 %633 }
 0x2ea   : > { %v639_v14 = vmul.f32 %v634_v9, %v615_v8 }
 0x2f3   : > { %v685_v58 = vpop.f32.mrb[8].mxu0 }
 0x2f4   : > { %v829_v59 = vadd.f32 %v685_v58, %v636_v55  ;;  %v1077_v60 = vpop.f32.mrb[9].mxu0 }
 0x2f5   : > { %v688_v61 = vpop.f32.mrb[10].mxu0 }
 0x2f6   : > { %833 = vst.msk [vmem:[#allocation4] sm:$0xff] %vm299_vm1, %v829_v59  ;;  %v1078_v63 = vpop.f32.mrb[11].mxu0 }
 0x2f7   : > { %v731_v1 = vpop.f32.mrb[8].mxu1 }
 0x2f8   : > { %v830_v2 = vadd.f32 %v731_v1, %v637_v62  ;;  %v1083_v3 = vpop.f32.mrb[9].mxu1 }
 0x2f9   : > { %v734_v5 = vpop.f32.mrb[10].mxu1 }
 0x2fa   : > { %834 = vst.msk [vmem:[#allocation4 + $0x8] sm:$0xff] %vm299_vm1, %v830_v2  ;;  %v1084_v7 = vpop.f32.mrb[11].mxu1 }
 0x2fb   : > { %v777_v10 = vpop.f32.mrb[12].mxu0 }
 0x2fc   : > { %v831_v11 = vadd.f32 %v777_v10, %v638_v6  ;;  %v1089_v12 = vpop.f32.mrb[13].mxu0 }
 0x2fd   : > { %v780_v13 = vpop.f32.mrb[14].mxu0 }
 0x2fe   : > { %835 = vst.msk [vmem:[#allocation4 + $0x10] sm:$0xff] %vm299_vm1, %v831_v11  ;;  %v1090_v15 = vpop.f32.mrb[15].mxu0 }
 0x2ff   : > { %v823_v16 = vpop.f32.mrb[12].mxu1 }
 0x300   : > { %v832_v17 = vadd.f32 %v823_v16, %v639_v14  ;;  %v1095_v18 = vpop.f32.mrb[13].mxu1 }
 0x301   : > { %v826_v19 = vpop.f32.mrb[14].mxu1 }
 0x302   : > { %836 = vst.msk [vmem:[#allocation4 + $0x18] sm:$0xff] %vm299_vm1, %v832_v17  ;;  %v1096_v20 = vpop.f32.mrb[15].mxu1 }
 0x303 PF: > { %v846_v21 = vld [vmem:[#allocation3 + $0x10] sm:$0xff]  ;;  %v844_v22 = vld [vmem:[#allocation3] sm:$0xff]  ;;  %v847_v23 = vld [vmem:[#allocation3 + $0x18] sm:$0xff]  ;;  %v1200_v24 = vmov 0   ;;  %vm892_vm9 = vcmask 60416  }
 0x304   : > { %1147 = vset.pattern.permute.xlu1 %v1200_v24  ;;  %1146 = vset.pattern.permute.xlu0 %v1200_v24  ;;  %vm850_vm5 = vcmp.gt.f32.partialorder %v846_v21, 0.0  ;;  %vm848_vm6 = vcmp.gt.f32.partialorder %v844_v22, 0.0  ;;  %vm851_vm7 = vcmp.gt.f32.partialorder %v847_v23, 0.0  ;;  %v845_v25 = vld [vmem:[#allocation3 + $0x8] sm:$0xff]  ;;  %v856_v4 = vld [vmem:[#allocation4] sm:$0xff] }
 0x305   : > { %v854_v26 = vsel %vm850_vm5, %v846_v21, 1.0  ;;  %v852_v27 = vsel %vm848_vm6, %v844_v22, 1.0  ;;  %v855_v28 = vsel %vm851_vm7, %v847_v23, 1.0  ;;  %vm849_vm8 = vcmp.gt.f32.partialorder %v845_v25, 0.0  ;;  %v858_v36 = vld [vmem:[#allocation4 + $0x10] sm:$0xff]  ;;  %v857_v39 = vld [vmem:[#allocation4 + $0x8] sm:$0xff] }
 0x306   : > { %1148 = vrcp.f32 %v854_v26  ;;  %v853_v29 = vsel %vm849_vm8, %v845_v25, 1.0 }
 0x307   : > { %1150 = vrcp.f32 %v852_v27 }
 0x308   : > { %1152 = vrcp.f32 %v855_v28 }
 0x309   : > { %1154 = vrcp.f32 %v853_v29  ;;  %v859_v38 = vld [vmem:[#allocation4 + $0x18] sm:$0xff] }
 0x310   : > { %v1149_v30 = vpop.eup %1148 }
 0x311   : > { %v1151_v31 = vpop.eup %1150  ;;  %876 = vperm.xlu1 %1147, %v1149_v30  }
 0x312   : > { %v1153_v32 = vpop.eup %1152  ;;  %866 = vperm.xlu0 %1146, %v1151_v31  }
 0x313   : > { %v1155_v33 = vpop.eup %1154 }
 0x315   : > { %881 = vperm.xlu1 %1147, %v1153_v32  }
 0x316   : > { %871 = vperm.xlu0 %1146, %v1155_v33  }
 0x390   : > { %v877_v34 = vpop.permute.xlu1 %876 }
 0x391   : > { %v867_v35 = vpop.permute.xlu0 %866  ;;  %v886_v42 = vmul.f32 %v877_v34, %v858_v36 }
 0x392   : > { %v884_v37 = vmul.f32 %v867_v35, %v856_v4 }
 0x393   : > { %v890_v47 = vpack.c.bf16 %v886_v42, %v886_v42 }
 0x394   : > { %v888_v40 = vpack.c.bf16 %v884_v37, %v884_v37  ;;  %v882_v41 = vpop.permute.xlu1 %881 }
 0x395   : > { %v872_v43 = vpop.permute.xlu0 %871  ;;  %v887_v44 = vmul.f32 %v882_v41, %v859_v38  ;;  %895 = vst.msk [vmem:[%s1287_s12 + $0x8] sm:$0xf] %vm892_vm9, %v890_v47 }
 0x396   : > { %893 = vst.msk [vmem:[%s1287_s12] sm:$0xf] %vm892_vm9, %v888_v40  ;;  %v885_v45 = vmul.f32 %v872_v43, %v857_v39 }
 0x397   : > { %v891_v48 = vpack.c.bf16 %v887_v44, %v887_v44 }
 0x398   : > { %v889_v46 = vpack.c.bf16 %v885_v45, %v885_v45 }
 0x399   : > { %896 = vst.msk [vmem:[%s1287_s12 + $0xc] sm:$0xf] %vm892_vm9, %v891_v48 }
 0x39a   : > { %894 = vst.msk [vmem:[%s1287_s12 + $0x4] sm:$0xf] %vm892_vm9, %v889_v46 }
 0x39b PF: > { %s20_s22 = sadd.s32 1, %s1192_s22   ;;  %s1432_s20 = smov %s1188_s21 }
 0x39c   : > { %p17_p11 = scmp.ge.s32.totalorder %s20_s22, 4   ;;  %s1433_s21 = smov %s1435_s0 }
 0x39e   :  { %19 = sbr.rel (!%p17_p11) target bundleno = 17 (0x11), region = 80 }

// kernel: transformer_forward.16
= control target key start
LH: loop header
LB: loop body
LE: loop exit
PB: predicated region body
PF: predicated region fallthrough
CT: control target
= control target key end

     0   :  { %s633_s24 = smov 0   ;;  %s690_s0 = inlined_call_operand.vmem [shape: bf16[16,32], index: 0, kind: input, shape index: {}]   ;;  %s691_s1 = inlined_call_operand.vmem [shape: bf16[32,64], index: 1, kind: input, shape index: {}]   ;;  %s692_s2 = inlined_call_operand.vmem [shape: f32[1,64], index: 2, kind: input, shape index: {}]   ;;  %s693_s3 = inlined_call_operand.vmem [shape: bf16[64,32], index: 3, kind: input, shape index: {}]   ;;  %s694_s4 = inlined_call_operand.vmem [shape: f32[1,32], index: 4, kind: input, shape index: {}]   ;;  %s695_s5 = inlined_call_operand.vmem [shape: f32[1,32], index: 5, kind: input, shape index: {}]   ;;  %s696_s6 = inlined_call_operand.vmem [shape: f32[1,32], index: 6, kind: input, shape index: {}]   ;;  %s697_s7 = inlined_call_operand.vmem [shape: bf16[16,32], index: 7, kind: output, shape index: {}]  }
   0x1 LB: > { %s516_s25 = sadd.s32 4294967295, %s589_s24   ;;  %p520_p0 = scmp.ge.s32.totalorder %s589_s24, 1  ;;  %s589_s24 = sphi %s633_s24, %s17_s24  }
   0x2   : > { %p236_p1 = scmp.lt.s32.totalorder %s589_s24, 3 }
   0x4   : > { %p237_p2 = pnand %p520_p0, %p236_p1 }
   0x5   : > { %v575_v0 = vld [vmem:[%s691_s1] sm:$0xff] (!%p237_p2)   ;;  %v591_v1 = vmov (!%p237_p2), 0.0   ;;  %v576_v2 = vld [vmem:[%s691_s1 + $0x8] sm:$0xff] (!%p237_p2)   ;;  %vm592_vm0 = vmmov (!%p237_p2), 0   ;;  %p266_p3 = scmp.lt.s32.totalorder (!%p237_p2), %s516_s25, 1  ;;  %vm299_vm1 = vcmask (!%p237_p2), 261120  }
   0x6   : > { %240 = sbr.rel (%p237_p2) target bundleno = 767 (0x2ff), region = 48  ;;  %545 = vmatprep.subr.bf16.mxu0 (!%p237_p2), %v591_v1  ;;  %553 = vmatprep.subr.bf16.mxu1 (!%p237_p2), %v591_v1  ;;  %v577_v3 = vld [vmem:[%s693_s3] sm:$0xff] (!%p237_p2)   ;;  %v578_v4 = vld [vmem:[%s693_s3 + $0x8] sm:$0xff] (!%p237_p2)   ;;  %v579_v6 = vld [vmem:[%s693_s3 + $0x10] sm:$0xff] (!%p237_p2)   ;;  %vm384_vm2 = vcmask (!%p237_p2), 523264   ;;  %vm461_vm3 = vcmask (!%p237_p2), 257024  }
   0x7   : > { %546 = vmatpush3.bf16.msra.mxu0 (!%p237_p2), %v575_v0  ;;  %549 = vmatprep.mubr.msk.bf16.mxu0 (!%p237_p2), %vm592_vm0, %v591_v1  ;;  %v580_v7 = vld [vmem:[%s693_s3 + $0x18] sm:$0xff] (!%p237_p2)   ;;  %v523_v8 = vld [vmem:[%s692_s2] ss:$0 sm:$0xff] (!%p237_p2) }
   0x8   : > { %547 = vmatprep.subr.bf16.mxu0 (!%p237_p2), %v591_v1  ;;  %561 = vmatprep.mubr.msk.bf16.mxu1 (!%p237_p2), %vm592_vm0, %v591_v1  ;;  %v527_v16 = vld [vmem:[%s694_s4] ss:$0 sm:$0xff] (!%p237_p2) }
   0x9   : > { %554 = vmatpush3.bf16.msra.mxu1 (!%p237_p2), %v577_v3  ;;  %v533_v34 = vld [vmem:[%s695_s5] ss:$0 sm:$0xff] (!%p237_p2) }
   0xa   : > { %555 = vmatprep.subr.bf16.mxu1 (!%p237_p2), %v591_v1  ;;  %v534_v36 = vld [vmem:[%s696_s6] ss:$0 sm:$0xff] (!%p237_p2) }
   0xb   : > { %548 = vmatpush3.bf16.msra.mxu0 (!%p237_p2), %v576_v2 }
   0xd   : > { %s699_s25 = smov (!%p266_p3, %s516_s25), 1  ;;  %556 = vmatpush3.bf16.msra.mxu1 %v578_v4 }
   0xe   : > { %s521_s11 = sshll.u32 %s699_s25, 2  ;;  %557 = vmatprep.subr.bf16.mxu1 %v591_v1 }
   0xf   : > { %s269_s14 = scalar_lea.vmem %s690_s0, %s521_s11  ;;  %s273_s8 = scalar_lea.vmem %s697_s7, %s521_s11 }
  0x10   : > { %v275_v5 = vld [vmem:[%s269_s14] sm:$0xf] }
  0x11   : > { %550 = vmatmul.mubr.msk.bf16.vlgmr.msra.gmra.mrb[0].mxu0 %vm299_vm1, %v275_v5  ;;  %558 = vmatpush3.bf16.msra.mxu1 %v579_v6  ;;  %v428_v17 = vunpack.c.l.bf16 %v275_v5 }
  0x12   : > { %559 = vmatprep.subr.bf16.mxu1 %v591_v1 }
  0x15   : > { %560 = vmatpush3.bf16.msra.mxu1 %v580_v7 }
  0xe4   : > { %v337_v9 = vpop.f32.mrb[0].mxu0 }
  0xe5   : > { %v338_v10 = vadd.f32 %v523_v8, %v337_v9  ;;  %v551_v11 = vpop.f32.mrb[1].mxu0 }
  0xe6   : > { %v340_v12 = vpop.f32.mrb[2].mxu0 }
  0xe7   : > { %v343_v13 = vmax.f32 %v338_v10, 0.0  ;;  %v552_v14 = vpop.f32.mrb[3].mxu0 }
  0xe9   : > { %v344_v15 = vpack.c.bf16 %v343_v13, %v343_v13 }
  0xeb   : > { %562 = vmatmul.mubr.msk.bf16.vlgmr.msra.gmra.mrb[0].mxu1 %vm384_vm2, %v344_v15 }
 0x1be   : > { %v422_v18 = vpop.f32.mrb[0].mxu1 }
 0x1bf   : > { %v423_v19 = vadd.f32 %v527_v16, %v422_v18  ;;  %v563_v20 = vpop.f32.mrb[1].mxu1 }
 0x1c0   : > { %v425_v21 = vpop.f32.mrb[2].mxu1 }
 0x1c1   : > { %v564_v22 = vpop.f32.mrb[3].mxu1  ;;  %v429_v23 = vadd.f32 %v428_v17, %v423_v19 }
 0x1c3   : > { %v430_v24 = vsel %vm299_vm1, %v429_v23, 0.0 }
 0x1c4   : > { %431 = vadd.xlane.f32.xlu0 %v430_v24 }
 0x251   : > { %v432_v25 = vpop.xlane.xlu0 %431 }
 0x252   : > { %v434_v26 = vmul.f32 0.03125, %v432_v25 }
 0x254   : > { %v435_v27 = vsub.f32 %v429_v23, %v434_v26 }
 0x256   : > { %v436_v28 = vmul.f32 %v435_v27, %v435_v27 }
 0x258   : > { %v437_v29 = vsel %vm299_vm1, %v436_v28, 0.0 }
 0x259   : > { %438 = vadd.xlane.f32.xlu0 %v437_v29 }
 0x2e6   : > { %v439_v30 = vpop.xlane.xlu0 %438 }
 0x2e7   : > { %v440_v31 = vmul.f32 0.03125, %v439_v30 }
 0x2e9   : > { %v441_v32 = vadd.f32 1e-05, %v440_v31 }
 0x2eb   : > { %581 = vrsqrt.f32 %v441_v32 }
 0x2f5   : > { %v582_v33 = vpop.eup %581 }
 0x2f6   : > { %v443_v35 = vmul.f32 %v582_v33, %v435_v27 }
 0x2f8   : > { %v451_v37 = vmul.f32 %v533_v34, %v443_v35 }
 0x2fa   : > { %v459_v38 = vadd.f32 %v534_v36, %v451_v37 }
 0x2fc   : > { %v460_v39 = vpack.c.bf16 %v459_v38, %v459_v38 }
 0x2fe   : > { %462 = vst.msk [vmem:[%s273_s8] sm:$0xf] %vm461_vm3, %v460_v39 }
 0x2ff PF: > { %s17_s24 = sadd.s32 1, %s589_s24  }
 0x300   : > { %p14_p4 = scmp.ge.s32.totalorder %s17_s24, 4  }
 0x302   :  { %16 = sbr.rel (!%p14_p4) target bundleno = 1 (0x1), region = 78 }

// kernel: transformer_forward.25
= control target key start
LH: loop header
LB: loop body
LE: loop exit
PB: predicated region body
PF: predicated region fallthrough
CT: control target
= control target key end

     0   :  { %s486_s12 = smov 0   ;;  %s488_s13 = smov 0   ;;  %s528_s0 = inlined_call_operand.vmem [shape: bf16[16,32], index: 0, kind: input, shape index: {}]   ;;  %s529_s1 = inlined_call_operand.vmem [shape: bf16[32,128], index: 1, kind: input, shape index: {}]   ;;  %s530_s2 = inlined_call_operand.vmem [shape: f32[1,128], index: 2, kind: input, shape index: {}]   ;;  %s531_s3 = inlined_call_operand.vmem [shape: f32[16,128], index: 3, kind: output, shape index: {}]  }
   0x1   :  { %s490_s14 = smov 0  }
   0x2 LB: > { %s25_s15 = sadd.s32 1, %s458_s13  ;;  %p392_p0 = scmp.ge.s32.totalorder %s462_s14, 1  ;;  %s462_s14 = sphi %s490_s14, %s13_s14   ;;  %s458_s13 = sphi %s488_s13, %s533_s13   ;;  %s454_s12 = sphi %s486_s12, %s532_s12  }
   0x3   : > { %p27_p1 = scmp.ge.s32.totalorder %s25_s15, 2  ;;  %p167_p2 = scmp.lt.s32.totalorder %s462_s14, 3 }
   0x5   : > { %s535_s15 = smov (%p27_p1, %s25_s15), 0  ;;  %p168_p3 = pnand %p392_p0, %p167_p2 }
   0x6   : > { %v438_v0 = vld [vmem:[%s529_s1] sm:$0xff] (!%p168_p3)   ;;  %v464_v1 = vmov (!%p168_p3), 0.0   ;;  %v439_v2 = vld [vmem:[%s529_s1 + $0x8] sm:$0xff] (!%p168_p3)   ;;  %vm465_vm0 = vmmov (!%p168_p3), 0   ;;  %p199_p4 = scmp.lt.s32.totalorder (!%p168_p3), %s454_s12, 1  ;;  %vm242_vm1 = vcmask (!%p168_p3), 261120  }
   0x7   : > { %171 = sbr.rel (%p168_p3) target bundleno = 233 (0xe9), region = 32  ;;  %404 = vmatprep.subr.bf16.mxu0 (!%p168_p3), %v464_v1  ;;  %408 = vmatprep.mubr.msk.bf16.mxu0 (!%p168_p3), %vm465_vm0, %v464_v1  ;;  %v395_v4 = vld [vmem:[%s530_s2] ss:$0 sm:$0xff] (!%p168_p3) }
   0x8   : > { %405 = vmatpush3.bf16.msra.mxu0 (!%p168_p3), %v438_v0 }
   0x9   : > { %406 = vmatprep.subr.bf16.mxu0 (!%p168_p3), %v464_v1 }
   0xc   : > { %407 = vmatpush3.bf16.msra.mxu0 (!%p168_p3), %v439_v2 }
   0xe   : > { %s537_s12 = smov (!%p199_p4, %s454_s12), 1 }
   0xf   : > { %s393_s20 = sshll.u32 %s537_s12, 2  ;;  %s394_s24 = sshll.u32 %s537_s12, 3 }
  0x10   : > { %s202_s23 = scalar_lea.vmem %s528_s0, %s393_s20  ;;  %s216_s29 = scalar_lea.vmem %s531_s3, %s394_s24 }
  0x11   : > { %v218_v3 = vld [vmem:[%s202_s23] sm:$0xf] }
  0x12   : > { %409 = vmatmul.mubr.msk.bf16.vlgmr.msra.gmra.mrb[0].mxu0 %vm242_vm1, %v218_v3 }
  0xe5   : > { %v280_v5 = vpop.f32.mrb[0].mxu0 }
  0xe6   : > { %v281_v6 = vadd.f32 %v395_v4, %v280_v5  ;;  %v410_v7 = vpop.f32.mrb[1].mxu0 }
  0xe7   : > { %v283_v8 = vpop.f32.mrb[2].mxu0 }
  0xe8   : > { %286 = vst [vmem:[%s216_s29] sm:$0xff] %v281_v6  ;;  %v411_v9 = vpop.f32.mrb[3].mxu0 }
  0xe9 PF: > { %s13_s14 = sadd.s32 1, %s462_s14   ;;  %s532_s12 = smov %s458_s13 }
  0xea   : > { %p10_p5 = scmp.ge.s32.totalorder %s13_s14, 4   ;;  %s533_s13 = smov %s535_s15 }
  0xec   :  { %12 = sbr.rel (!%p10_p5) target bundleno = 2 (0x2), region = 68 }

</bundles_post_ra>
